<compile_context>
chip_gen: v6e
topology: v6e:2x2x1
jax: 0.10.0
libtpu: 0.0.40
codegen_flags: <defaults>
</compile_context>

<pallas_src>
import functools
import math

import jax
import jax.numpy as jnp
from jax.experimental import pallas as pl
from jax.experimental.pallas import tpu as pltpu

# Raised scoped-VMEM limit: 32 MiB matches the v6e/v7x defaults and lifts
# v5e's 16 MiB default so the tiled blocks below can double-buffer.
_VMEM_LIMIT = 32 * 1024 * 1024


# ----------------------------- small helpers -----------------------------

def _round_up(x, m):
    return ((x + m - 1) // m) * m


def _pick_tile(dim, target, align):
    """Largest `align`-aligned tile <= target that divides dim; falls back to
    the full extent (block == full array dim is always legal)."""
    if dim <= target:
        return dim
    t = (target // align) * align
    while t >= align:
        if dim % t == 0:
            return t
        t -= align
    return dim


def _pick_batch_block(b, target=8):
    """Batch-block size for the LSTM grid (multiple of 8 or the whole batch)."""
    if b <= target:
        return b
    t = (target // 8) * 8
    while t >= 8:
        if b % t == 0:
            return t
        t -= 8
    return b


def _bf16(x):
    return x.astype(jnp.bfloat16)


def _ln(y, g, b):
    """LayerNorm over the last dim (f32 statistics), eps matches nn.LayerNorm."""
    mu = jnp.mean(y, axis=-1, keepdims=True)
    var = jnp.mean((y - mu) ** 2, axis=-1, keepdims=True)
    return (y - mu) * jax.lax.rsqrt(var + 1e-5) * g + b


# ----------------------------- tiled linear -----------------------------

def _matmul_kernel(*refs, activation, has_residual, has_ln):
    """acc += x_tile @ w_tile (bf16 MXU, f32 acc); epilogue on the last k step:
    + bias [; relu] [; + residual] [; LayerNorm]."""
    x_ref, w_ref, b_ref = refs[0], refs[1], refs[2]
    idx = 3
    res_ref = refs[idx] if has_residual else None
    idx += int(has_residual)
    g_ref = refs[idx] if has_ln else None
    bln_ref = refs[idx + 1] if has_ln else None
    idx += 2 * int(has_ln)
    o_ref, acc_ref = refs[idx], refs[idx + 1]

    k = pl.program_id(2)

    @pl.when(k == 0)
    def _():
        acc_ref[...] = jnp.zeros_like(acc_ref)

    acc_ref[...] += jnp.dot(_bf16(x_ref[...]), _bf16(w_ref[...]),
                            preferred_element_type=jnp.float32)

    @pl.when(k == pl.num_programs(2) - 1)
    def _():
        y = acc_ref[...] + b_ref[...]
        if activation == "relu":
            y = jnp.maximum(y, 0.0)
        if has_residual:
            y = y + res_ref[...]
        if has_ln:
            y = _ln(y, g_ref[...], bln_ref[...])
        o_ref[...] = y.astype(o_ref.dtype)


def linear(x, w, b, *, activation=None, residual=None, ln=None,
           tm=256, tn=256, tk=512):
    """y = x@w + b [; relu] [; + residual] [; LayerNorm] as a tiled,
    double-buffered MXU matmul (bf16 operands, f32 accumulation)."""
    M, K = x.shape
    N = w.shape[1]
    tm = _pick_tile(M, tm, 8)
    tk = _pick_tile(K, tk, 128)
    # LayerNorm reduces over the whole output row -> keep N un-tiled for it.
    tn = N if ln is not None else _pick_tile(N, tn, 128)

    in_specs = [pl.BlockSpec((tm, tk), lambda i, j, k: (i, k)),
                pl.BlockSpec((tk, tn), lambda i, j, k: (k, j)),
                pl.BlockSpec((1, tn), lambda i, j, k: (0, j))]
    args = [x, w, b.reshape(1, N)]
    if residual is not None:
        in_specs.append(pl.BlockSpec((tm, tn), lambda i, j, k: (i, j)))
        args.append(residual)
    if ln is not None:
        in_specs += [pl.BlockSpec((1, tn), lambda i, j, k: (0, j))] * 2
        args += [ln[0].reshape(1, N), ln[1].reshape(1, N)]

    return pl.pallas_call(
        functools.partial(_matmul_kernel, activation=activation,
                          has_residual=residual is not None,
                          has_ln=ln is not None),
        grid=(M // tm, N // tn, K // tk),
        in_specs=in_specs,
        out_specs=pl.BlockSpec((tm, tn), lambda i, j, k: (i, j)),
        out_shape=jax.ShapeDtypeStruct((M, N), jnp.float32),
        scratch_shapes=[pltpu.VMEM((tm, tn), jnp.float32)],
        compiler_params=pltpu.CompilerParams(
            dimension_semantics=("parallel", "parallel", "arbitrary"),
            vmem_limit_bytes=_VMEM_LIMIT),
    )(*args)


# ------------------------------ fused LSTM ------------------------------

def _lstm_kernel(*refs, ts, hidden, num_x, epilogue):
    """One (batch-block, time-block) step of a fused single-layer LSTM:
      * fused input projection xp = sum_i x_i @ W_ih_i + b  (bf16 MXU, f32 acc)
      * `ts` statically-unrolled recurrent steps; h/c persist in VMEM scratch
        across the time ("arbitrary") grid axis
      * optional fused epilogue: pad-mask [+ residual] + LayerNorm [+ re-mask],
        valid mask built in-kernel from per-row lengths (no HBM mask stream).
    """
    H = hidden
    pos = 0
    xs = [refs[pos + i][...] for i in range(num_x)]
    pos += num_x
    ws = [refs[pos + i][...] for i in range(num_x)]
    pos += num_x
    b = refs[pos][...]
    whh = refs[pos + 1][...]
    pos += 2
    if epilogue is not None:
        lens = refs[pos][...]            # (bb, 1) int32
        gamma = refs[pos + 1][...]       # (1, 1, H)
        beta = refs[pos + 2][...]
        pos += 3
    o_ref, h_scr, c_scr = refs[pos], refs[pos + 1], refs[pos + 2]

    @pl.when(pl.program_id(1) == 0)      # new batch block -> zero initial state
    def _():
        h_scr[...] = jnp.zeros_like(h_scr)
        c_scr[...] = jnp.zeros_like(c_scr)

    bb = xs[0].shape[0]
    # Fused input projection for all ts timesteps in one MXU matmul (the
    # (bb,ts)->(bb*ts) collapse is layout-free because ts is a multiple of 8).
    xp = jnp.dot(_bf16(xs[0].reshape(bb * ts, xs[0].shape[2])), _bf16(ws[0]),
                 preferred_element_type=jnp.float32)
    for xi, wi in zip(xs[1:], ws[1:]):
        xp += jnp.dot(_bf16(xi.reshape(bb * ts, xi.shape[2])), _bf16(wi),
                      preferred_element_type=jnp.float32)
    xp = (xp + b).reshape(bb, ts, 4 * H)

    whh_bf = _bf16(whh)
    h = h_scr[...]
    c = c_scr[...]
    for s in range(ts):                  # static unroll -- LLO sees everything
        gates = xp[:, s, :] + jnp.dot(_bf16(h), whh_bf,
                                      preferred_element_type=jnp.float32)
        # PyTorch gate order: i, f, g, o.  (Production: pad H to a multiple of
        # 128 so these slices are lane-aligned.)
        i_g = jax.nn.sigmoid(gates[:, 0 * H:1 * H])
        f_g = jax.nn.sigmoid(gates[:, 1 * H:2 * H])
        g_g = jnp.tanh(gates[:, 2 * H:3 * H])
        o_g = jax.nn.sigmoid(gates[:, 3 * H:4 * H])
        c = f_g * c + i_g * g_g
        h = o_g * jnp.tanh(c)
        o_ref[:, s, :] = h.astype(o_ref.dtype)
    h_scr[...] = h
    c_scr[...] = c

    if epilogue is not None:
        # Padding is strictly trailing in time, so state contamination from
        # padded steps never reaches a valid step.
        t_idx = pl.program_id(1) * ts + jax.lax.broadcasted_iota(
            jnp.int32, (bb, ts), 1)
        valid = (t_idx < lens).astype(jnp.float32)[:, :, None]    # (bb, ts, 1)
        y = o_ref[...] * valid
        if epilogue == "listener":
            y = y + xs[0]                # residual (input already zero-padded)
        z = _ln(y, gamma, beta)
        if epilogue == "listener":
            z = z * valid                # re-zero pads (pack/pad round trip)
        o_ref[...] = z.astype(o_ref.dtype)


def lstm(xs, w_ihs, w_hh, b, *, epilogue=None, lens=None, gamma=None, beta=None,
         ts_max=32, bb_max=8):
    """Single-layer unidirectional LSTM over batch-major inputs.

    xs: list of 1 or 2 (B, T, In_i) inputs whose projections are summed (this
    replaces concat([x1, x2]) @ W_ih for the decoder).  `epilogue` fuses the
    listener/reader pad-mask + LayerNorm.  Returns (B, T, H), f32.
    """
    B, T, _ = xs[0].shape
    H = w_hh.shape[0]
    ts = min(ts_max, _round_up(T, 8))
    t_pad = _round_up(T, ts)
    if t_pad != T:
        xs = [jnp.pad(x, ((0, 0), (0, t_pad - T), (0, 0))) for x in xs]
    bb = _pick_batch_block(B, bb_max)
    num_x = len(xs)

    in_specs = [pl.BlockSpec((bb, ts, x.shape[2]), lambda bi, ti: (bi, ti, 0))
                for x in xs]
    args = list(xs)
    in_specs += [pl.BlockSpec(w.shape, lambda bi, ti: (0, 0)) for w in w_ihs]
    args += list(w_ihs)
    in_specs += [pl.BlockSpec((1, 4 * H), lambda bi, ti: (0, 0)),
                 pl.BlockSpec((H, 4 * H), lambda bi, ti: (0, 0))]
    args += [b.reshape(1, 4 * H), w_hh]
    if epilogue is not None:
        in_specs += [pl.BlockSpec((bb, 1), lambda bi, ti: (bi, 0)),
                     pl.BlockSpec((1, 1, H), lambda bi, ti: (0, 0, 0)),
                     pl.BlockSpec((1, 1, H), lambda bi, ti: (0, 0, 0))]
        args += [lens.reshape(B, 1).astype(jnp.int32),
                 gamma.reshape(1, 1, H), beta.reshape(1, 1, H)]

    out = pl.pallas_call(
        functools.partial(_lstm_kernel, ts=ts, hidden=H, num_x=num_x,
                          epilogue=epilogue),
        grid=(B // bb, t_pad // ts),
        in_specs=in_specs,
        out_specs=pl.BlockSpec((bb, ts, H), lambda bi, ti: (bi, ti, 0)),
        out_shape=jax.ShapeDtypeStruct((B, t_pad, H), jnp.float32),
        scratch_shapes=[pltpu.VMEM((bb, H), jnp.float32),
                        pltpu.VMEM((bb, H), jnp.float32)],
        # Batch axis "parallel" -> v7x megacore can shard batch blocks; the
        # recurrent time axis stays "arbitrary".  Constant-index weight blocks
        # are still double-buffered by the auto-pipeliner (negligible at these
        # weight sizes; stage them into scratch for production-size LSTMs).
        compiler_params=pltpu.CompilerParams(
            dimension_semantics=("parallel", "arbitrary"),
            vmem_limit_bytes=_VMEM_LIMIT),
    )(*args)
    return out[:, :T]


# ----------------------------- attention -----------------------------

def _attn_kernel(q_ref, k_ref, v_ref, bias_ref, *out_refs, scale, return_attn):
    q, k, v = q_ref[...], k_ref[...], v_ref[...]
    s = jnp.einsum("bld,bsd->bls", _bf16(q), _bf16(k),
                   preferred_element_type=jnp.float32) * scale + bias_ref[...]
    s_max = jnp.max(s, axis=-1, keepdims=True)
    p = jnp.exp(s - s_max)
    attn = p * pl.reciprocal(jnp.sum(p, axis=-1, keepdims=True), approx=True)
    if return_attn:
        out_refs[1][...] = attn.astype(out_refs[1].dtype)
    ctx = jnp.einsum("bls,bsd->bld", _bf16(attn), _bf16(v),
                     preferred_element_type=jnp.float32)
    out_refs[0][...] = ctx.astype(out_refs[0].dtype)


def scaled_dot_attention(q, kv, bias, scale, d, *, return_attn=True,
                         attn_dtype=jnp.float32, lt_target=256):
    """q:(B,L,D), kv:(B,S,2D) merged K/V projection, bias:(B,1,S) additive
    finite -1e30 at key padding.  Batched over B inside one kernel; the grid
    tiles the query axis ("parallel" -> v7x megacore)."""
    B, L, D = q.shape
    S = kv.shape[1]
    lt = _pick_tile(L, lt_target, 8)

    if d % 128 == 0:
        # Lane-aligned: split K/V at the BlockSpec level (two views of kv).
        k_arr, v_arr = kv, kv
        k_spec = pl.BlockSpec((B, S, d), lambda l: (0, 0, 0))
        v_spec = pl.BlockSpec((B, S, d), lambda l: (0, 0, 1))
    else:
        # Toy path: a non-128-aligned in-VMEM split would force re-layout
        # copies, so split once at the XLA level instead.
        k_arr, v_arr = kv[..., :d], kv[..., d:]
        k_spec = pl.BlockSpec((B, S, d), lambda l: (0, 0, 0))
        v_spec = pl.BlockSpec((B, S, d), lambda l: (0, 0, 0))

    in_specs = [pl.BlockSpec((B, lt, D), lambda l: (0, l, 0)), k_spec, v_spec,
                pl.BlockSpec((B, 1, S), lambda l: (0, 0, 0))]
    if return_attn:
        out_specs = (pl.BlockSpec((B, lt, D), lambda l: (0, l, 0)),
                     pl.BlockSpec((B, lt, S), lambda l: (0, l, 0)))
        out_shape = (jax.ShapeDtypeStruct((B, L, D), jnp.float32),
                     jax.ShapeDtypeStruct((B, L, S), attn_dtype))
    else:
        out_specs = pl.BlockSpec((B, lt, D), lambda l: (0, l, 0))
        out_shape = jax.ShapeDtypeStruct((B, L, D), jnp.float32)

    res = pl.pallas_call(
        functools.partial(_attn_kernel, scale=scale, return_attn=return_attn),
        grid=(L // lt,),
        in_specs=in_specs,
        out_specs=out_specs,
        out_shape=out_shape,
        compiler_params=pltpu.CompilerParams(
            dimension_semantics=("parallel",),
            vmem_limit_bytes=_VMEM_LIMIT),
    )(q, k_arr, v_arr, bias)
    if return_attn:
        return res[0], res[1]
    return res, None


# --------------------------- parameter creation ---------------------------
# Weights are stored directly in the compute layout ((in, out) / (H, 4H)),
# so no transposes happen at call time.

def _uniform(key, shape, bound):
    return jax.random.uniform(key, shape, jnp.float32, -bound, bound)


def init_linear(key, in_dim, out_dim):
    k1, k2 = jax.random.split(key)
    b = 1.0 / math.sqrt(in_dim)
    return {"w": _uniform(k1, (in_dim, out_dim), b), "b": _uniform(k2, (out_dim,), b)}


def init_lstm(key, in_dim, hidden):
    k1, k2, k3, k4 = jax.random.split(key, 4)
    b = 1.0 / math.sqrt(hidden)
    return {"w_ih": _uniform(k1, (in_dim, 4 * hidden), b),
            "w_hh": _uniform(k2, (hidden, 4 * hidden), b),
            # b_ih + b_hh folded once into the input projection (same math)
            "b": _uniform(k3, (4 * hidden,), b) + _uniform(k4, (4 * hidden,), b)}


def init_asr_params(key, config):
    E, V = config["embed_dim"], config["vocab_size"]
    I, NL = config["input_dim"], config["listener_layer"]
    D = (2 ** NL) * I                     # attention_indim
    FF = 2 * D
    ks = iter(jax.random.split(key, 64))
    p = {}
    # Reader
    p["embedding"] = jax.random.normal(next(ks), (V, E), jnp.float32)
    p["reader_lstm"] = init_lstm(next(ks), E, 2 * E)
    p["reader_g"] = jnp.ones((2 * E,), jnp.float32)
    p["reader_b"] = jnp.zeros((2 * E,), jnp.float32)
    # Listener (pyramidal LSTM layers)
    p["listener"] = []
    dim = 2 * I
    for i in range(NL):
        if i > 0:
            dim = 2 * dim
        lp = init_lstm(next(ks), dim, dim)
        lp["g"] = jnp.ones((dim,), jnp.float32)
        lp["bn"] = jnp.zeros((dim,), jnp.float32)
        p["listener"].append(lp)
    # Attention block (nhead=1): q projection + merged kv projection
    inp = init_linear(next(ks), D, 3 * D)
    p["attn_w_q"], p["attn_b_q"] = inp["w"][:, :D], inp["b"][:D]
    p["attn_w_kv"], p["attn_b_kv"] = inp["w"][:, D:], inp["b"][D:]
    p["attn_out_proj"] = init_linear(next(ks), D, D)
    p["attn_linear1"] = init_linear(next(ks), D, FF)
    p["attn_linear2"] = init_linear(next(ks), FF, D)
    p["attn_norm1_g"] = jnp.ones((D,), jnp.float32)
    p["attn_norm1_b"] = jnp.zeros((D,), jnp.float32)
    p["attn_norm2_g"] = jnp.ones((D,), jnp.float32)
    p["attn_norm2_b"] = jnp.zeros((D,), jnp.float32)
    # Decoder rnn: input is [aligned ; read] -> split w_ih into two D-wide halves
    rnn = init_lstm(next(ks), 2 * D, D)
    p["rnn"] = {"w1": rnn["w_ih"][:D], "w2": rnn["w_ih"][D:],
                "w_hh": rnn["w_hh"], "b": rnn["b"]}
    p["classifier"] = init_linear(next(ks), D, V)
    return p


# ------------------------------ model forward ------------------------------

def listener_forward(x_pad, lens_s, params):
    """x_pad: (B, T, input_dim), trailing zero padding; lens_s: python ints.
    Returns batch-major listened (B, S, D), key-padding mask (B, S), lens."""
    B, T, F = x_pad.shape
    lens = list(lens_s)
    for lp in params["listener"]:
        # pyramidal reduction requires even (trailing-padded) lengths
        assert T % 2 == 0 and all(l % 2 == 0 for l in lens)
        T, F = T // 2, 2 * F
        x_pad = x_pad.reshape(B, T, F)
        lens = [l // 2 for l in lens]
        lens_arr = jnp.array(lens, jnp.int32).reshape(B, 1)
        # fused LSTM: input proj + recurrence + (mask -> +residual -> LN -> mask)
        x_pad = lstm([x_pad], [lp["w_ih"]], lp["w_hh"], lp["b"],
                     epilogue="listener", lens=lens_arr,
                     gamma=lp["g"], beta=lp["bn"])
    valid = (jnp.arange(T)[None, :] < jnp.array(lens)[:, None]).astype(jnp.float32)
    mask_s = 1.0 - valid                                           # 1.0 at padding
    return x_pad, mask_s, lens


def reader_forward(tokens_pad, lens_t, params):
    B, L = tokens_pad.shape
    emb = params["embedding"][tokens_pad]                          # gather (JAX glue)
    rl = params["reader_lstm"]
    lens_arr = jnp.array(list(lens_t), jnp.int32).reshape(B, 1)
    # fused LSTM: input proj + recurrence + (mask -> LN), no re-mask (PyTorch)
    read = lstm([emb], [rl["w_ih"]], rl["w_hh"], rl["b"],
                epilogue="reader", lens=lens_arr,
                gamma=params["reader_g"], beta=params["reader_b"])
    valid = (jnp.arange(L)[None, :] < jnp.array(lens_t)[:, None]).astype(jnp.float32)
    mask_t = 1.0 - valid
    return read, mask_t


def attention_block(read_bf, listened_bf, mask_s, params):
    """nn.MultiheadAttention(D, 1) + post-norm FFN, inference semantics.
    Batch-major; q + merged kv projections; LNs fused into the linears."""
    B, L, D = read_bf.shape
    S = listened_bf.shape[1]
    q = linear(read_bf.reshape(B * L, D),
               params["attn_w_q"], params["attn_b_q"]).reshape(B, L, D)
    kv = linear(listened_bf.reshape(B * S, D),
                params["attn_w_kv"], params["attn_b_kv"]).reshape(B, S, 2 * D)
    bias = (mask_s * (-1e30)).reshape(B, 1, S).astype(jnp.float32)  # finite, no NaN
    scale = 1.0 / math.sqrt(D)                                      # nhead=1
    ctx, attn = scaled_dot_attention(q, kv, bias, scale, D)         # (B,L,D),(B,L,S)
    op = params["attn_out_proj"]
    src = linear(ctx.reshape(B * L, D), op["w"], op["b"],
                 ln=(params["attn_norm1_g"], params["attn_norm1_b"]))  # out_proj+norm1
    h = linear(src, params["attn_linear1"]["w"], params["attn_linear1"]["b"],
               activation="relu")
    src = linear(h, params["attn_linear2"]["w"], params["attn_linear2"]["b"],
                 residual=src,
                 ln=(params["attn_norm2_g"], params["attn_norm2_b"]))  # lin2+res+norm2
    return src.reshape(B, L, D), attn


def asr_forward(input_s_pad, lens_s, input_t_pad, lens_t, params, config):
    listened, mask_s, _ = listener_forward(input_s_pad, lens_s, params)
    read, mask_t = reader_forward(input_t_pad, lens_t, params)
    aligned, attn_tq = attention_block(read, listened, mask_s, params)
    B, L, D = read.shape
    # decoder LSTM: cat([aligned, read]) @ W_ih done as a fused dual projection
    # inside the LSTM kernel (no concat, no HBM intermediate).
    rp = params["rnn"]
    feat = lstm([aligned, read], [rp["w1"], rp["w2"]], rp["w_hh"], rp["b"])  # (B,L,D)
    cp = params["classifier"]
    logits = linear(feat.reshape(B * L, D), cp["w"], cp["b"]).reshape(B, L, -1)
    # extract(): concatenate valid rows of each batch element (static lens)
    out = jnp.concatenate([logits[i, :lens_t[i]] for i in range(B)], axis=0)
    return out, None, attn_tq


# ------------------------------------ main ------------------------------------

if __name__ == "__main__":
    # embed_dim must equal 2**(listener_layer-1) * input_dim for the PyTorch
    # module's shapes to be consistent (2*embed_dim == attention_indim).
    config = {"input_dim": 8, "listener_layer": 2, "embed_dim": 16,
              "vocab_size": 16, "dropout": 0.1, "device": None}

    key = jax.random.PRNGKey(0)
    kp, kx, kt = jax.random.split(key, 3)
    params = init_asr_params(kp, config)

    B = 2
    lens_s = [16, 12]                      # frame counts, divisible by 2**listener_layer
    lens_t = [7, 5]                        # token counts
    T_max, L_max = max(lens_s), max(lens_t)

    x_s = jax.random.normal(kx, (B, T_max, config["input_dim"]), jnp.float32)
    valid_s = (jnp.arange(T_max)[None, :] < jnp.array(lens_s)[:, None])
    x_s = x_s * valid_s[:, :, None]        # trailing zero-pad like pad_packed_sequence

    toks = jax.random.randint(kt, (B, L_max), 0, config["vocab_size"])
    valid_t = (jnp.arange(L_max)[None, :] < jnp.array(lens_t)[:, None])
    toks = jnp.where(valid_t, toks, 0).astype(jnp.int32)

    out, _, attn_tq = asr_forward(x_s, lens_s, toks, lens_t, params, config)
    jax.block_until_ready((out, attn_tq))

    assert out.shape == (sum(lens_t), config["vocab_size"])
    assert attn_tq.shape == (B, L_max, T_max // (2 ** config["listener_layer"]))
    print("KERNEL_OK")
</pallas_src>

<mosaic_0001>
module attributes {stable_mosaic.version = 11 : i64} {
  func.func @_lstm_kernel(%arg0: i32, %arg1: i32, %arg2: memref<2x8x16xf32, #tpu.memory_space<vmem>>, %arg3: memref<16x64xf32, #tpu.memory_space<vmem>>, %arg4: memref<1x64xf32, #tpu.memory_space<vmem>>, %arg5: memref<16x64xf32, #tpu.memory_space<vmem>>, %arg6: memref<2x1xi32, #tpu.memory_space<vmem>>, %arg7: memref<1x1x16xf32, #tpu.memory_space<vmem>>, %arg8: memref<1x1x16xf32, #tpu.memory_space<vmem>>, %arg9: memref<2x8x16xf32, #tpu.memory_space<vmem>>, %arg10: memref<2x16xf32, #tpu.memory_space<vmem>>, %arg11: memref<2x16xf32, #tpu.memory_space<vmem>>) attributes {dimension_semantics = [#tpu.dimension_semantics<parallel>, #tpu.dimension_semantics<arbitrary>], iteration_bounds = array<i64: 1, 1>, scalar_prefetch = 0 : i64, scratch_operands = 2 : i64, tpu.core_type = #tpu.core_type<tc>, window_params = [{transform_indices = @transform_0, window_bounds = array<i64: 2, 8, 16>}, {pipeline_mode = #tpu.pipeline_mode<synchronous>, transform_indices = @transform_1, window_bounds = array<i64: 16, 64>}, {pipeline_mode = #tpu.pipeline_mode<synchronous>, transform_indices = @transform_2, window_bounds = array<i64: 1, 64>}, {pipeline_mode = #tpu.pipeline_mode<synchronous>, transform_indices = @transform_3, window_bounds = array<i64: 16, 64>}, {transform_indices = @transform_4, window_bounds = array<i64: 2, 1>}, {pipeline_mode = #tpu.pipeline_mode<synchronous>, transform_indices = @transform_5, window_bounds = array<i64: 1, 1, 16>}, {pipeline_mode = #tpu.pipeline_mode<synchronous>, transform_indices = @transform_6, window_bounds = array<i64: 1, 1, 16>}, {transform_indices = @transform_7, window_bounds = array<i64: 2, 8, 16>}]} {
    %c0 = arith.constant 0 : index
    %c0_0 = arith.constant 0 : index
    %c0_1 = arith.constant 0 : index
    %0 = vector.load %arg2[%c0, %c0_0, %c0_1] : memref<2x8x16xf32, #tpu.memory_space<vmem>>, vector<2x8x16xf32>
    %c0_2 = arith.constant 0 : index
    %c0_3 = arith.constant 0 : index
    %1 = vector.load %arg3[%c0_2, %c0_3] : memref<16x64xf32, #tpu.memory_space<vmem>>, vector<16x64xf32>
    %c0_4 = arith.constant 0 : index
    %c0_5 = arith.constant 0 : index
    %2 = vector.load %arg4[%c0_4, %c0_5] : memref<1x64xf32, #tpu.memory_space<vmem>>, vector<1x64xf32>
    %c0_6 = arith.constant 0 : index
    %c0_7 = arith.constant 0 : index
    %3 = vector.load %arg5[%c0_6, %c0_7] : memref<16x64xf32, #tpu.memory_space<vmem>>, vector<16x64xf32>
    %c0_8 = arith.constant 0 : index
    %c0_9 = arith.constant 0 : index
    %4 = vector.load %arg6[%c0_8, %c0_9] : memref<2x1xi32, #tpu.memory_space<vmem>>, vector<2x1xi32>
    %c0_10 = arith.constant 0 : index
    %c0_11 = arith.constant 0 : index
    %c0_12 = arith.constant 0 : index
    %5 = vector.load %arg7[%c0_10, %c0_11, %c0_12] : memref<1x1x16xf32, #tpu.memory_space<vmem>>, vector<1x1x16xf32>
    %c0_13 = arith.constant 0 : index
    %c0_14 = arith.constant 0 : index
    %c0_15 = arith.constant 0 : index
    %6 = vector.load %arg8[%c0_13, %c0_14, %c0_15] : memref<1x1x16xf32, #tpu.memory_space<vmem>>, vector<1x1x16xf32>
    %c0_i32 = arith.constant 0 : i32
    %7 = arith.cmpi eq, %arg1, %c0_i32 : i32
    %8 = arith.extui %7 : i1 to i32
    %c0_i32_16 = arith.constant 0 : i32
    %9 = arith.cmpi ne, %8, %c0_i32_16 : i32
    scf.if %9 {
      %cst_85 = arith.constant 0.000000e+00 : f32
      %324 = vector.broadcast %cst_85 : f32 to vector<2x16xf32>
      %c0_86 = arith.constant 0 : index
      %c0_87 = arith.constant 0 : index
      %325 = vector.load %arg10[%c0_86, %c0_87] : memref<2x16xf32, #tpu.memory_space<vmem>>, vector<2x16xf32>
      tpu.vector_store %arg10[%c0_86, %c0_87], %324 {strides = array<i32>} : memref<2x16xf32, #tpu.memory_space<vmem>>, vector<2x16xf32>,
      %cst_88 = arith.constant 0.000000e+00 : f32
      %326 = vector.broadcast %cst_88 : f32 to vector<2x16xf32>
      %c0_89 = arith.constant 0 : index
      %c0_90 = arith.constant 0 : index
      %327 = vector.load %arg11[%c0_89, %c0_90] : memref<2x16xf32, #tpu.memory_space<vmem>>, vector<2x16xf32>
      tpu.vector_store %arg11[%c0_89, %c0_90], %326 {strides = array<i32>} : memref<2x16xf32, #tpu.memory_space<vmem>>, vector<2x16xf32>,
    } else {
    }
    %10 = vector.shape_cast %0 : vector<2x8x16xf32> to vector<16x16xf32>
    %11 = arith.truncf %10 : vector<16x16xf32> to vector<16x16xbf16>
    %12 = arith.truncf %1 : vector<16x64xf32> to vector<16x64xbf16>
    %cst = arith.constant dense<0.000000e+00> : vector<16x64xf32>
    %13 = tpu.matmul %11, %12, %cst {dimension_numbers = #tpu.dot_dimension_numbers<[1], [0], [0], [1], [0, 0, 1, 1], [], []>} : vector<16x16xbf16>, vector<16x64xbf16>, vector<16x64xf32> -> vector<16x64xf32>
    %14 = vector.broadcast %2 : vector<1x64xf32> to vector<16x64xf32>
    %15 = arith.addf %13, %14 : vector<16x64xf32>
    %16 = vector.shape_cast %15 : vector<16x64xf32> to vector<2x8x64xf32>
    %17 = arith.truncf %3 : vector<16x64xf32> to vector<16x64xbf16>
    %c0_17 = arith.constant 0 : index
    %c0_18 = arith.constant 0 : index
    %18 = vector.load %arg10[%c0_17, %c0_18] : memref<2x16xf32, #tpu.memory_space<vmem>>, vector<2x16xf32>
    %c0_19 = arith.constant 0 : index
    %c0_20 = arith.constant 0 : index
    %19 = vector.load %arg11[%c0_19, %c0_20] : memref<2x16xf32, #tpu.memory_space<vmem>>, vector<2x16xf32>
    %20 = vector.extract_strided_slice %16 {offsets = [0, 0, 0], sizes = [2, 1, 64], strides = [1, 1, 1]} : vector<2x8x64xf32> to vector<2x1x64xf32>
    %21 = vector.shape_cast %20 : vector<2x1x64xf32> to vector<2x64xf32>
    %22 = arith.truncf %18 : vector<2x16xf32> to vector<2x16xbf16>
    %cst_21 = arith.constant dense<0.000000e+00> : vector<2x64xf32>
    %23 = tpu.matmul %22, %17, %cst_21 {dimension_numbers = #tpu.dot_dimension_numbers<[1], [0], [0], [1], [0, 0, 1, 1], [], []>} : vector<2x16xbf16>, vector<16x64xbf16>, vector<2x64xf32> -> vector<2x64xf32>
    %24 = arith.addf %21, %23 : vector<2x64xf32>
    %25 = vector.extract_strided_slice %24 {offsets = [0, 0], sizes = [2, 16], strides = [1, 1]} : vector<2x64xf32> to vector<2x16xf32>
    %26 = arith.negf %25 : vector<2x16xf32>
    %27 = math.exp %26 : vector<2x16xf32>
    %cst_22 = arith.constant 1.000000e+00 : f32
    %28 = vector.broadcast %cst_22 : f32 to vector<2x16xf32>
    %29 = arith.addf %28, %27 : vector<2x16xf32>
    %30 = arith.divf %28, %29 : vector<2x16xf32>
    %31 = vector.extract_strided_slice %24 {offsets = [0, 16], sizes = [2, 16], strides = [1, 1]} : vector<2x64xf32> to vector<2x16xf32>
    %32 = arith.negf %31 : vector<2x16xf32>
    %33 = math.exp %32 : vector<2x16xf32>
    %cst_23 = arith.constant 1.000000e+00 : f32
    %34 = vector.broadcast %cst_23 : f32 to vector<2x16xf32>
    %35 = arith.addf %34, %33 : vector<2x16xf32>
    %36 = arith.divf %34, %35 : vector<2x16xf32>
    %37 = vector.extract_strided_slice %24 {offsets = [0, 32], sizes = [2, 16], strides = [1, 1]} : vector<2x64xf32> to vector<2x16xf32>
    %38 = math.tanh %37 : vector<2x16xf32>
    %39 = vector.extract_strided_slice %24 {offsets = [0, 48], sizes = [2, 16], strides = [1, 1]} : vector<2x64xf32> to vector<2x16xf32>
    %40 = arith.negf %39 : vector<2x16xf32>
    %41 = math.exp %40 : vector<2x16xf32>
    %cst_24 = arith.constant 1.000000e+00 : f32
    %42 = vector.broadcast %cst_24 : f32 to vector<2x16xf32>
    %43 = arith.addf %42, %41 : vector<2x16xf32>
    %44 = arith.divf %42, %43 : vector<2x16xf32>
    %45 = arith.mulf %36, %19 : vector<2x16xf32>
    %46 = arith.mulf %30, %38 : vector<2x16xf32>
    %47 = arith.addf %45, %46 : vector<2x16xf32>
    %48 = math.tanh %47 : vector<2x16xf32>
    %49 = arith.mulf %44, %48 : vector<2x16xf32>
    %c0_25 = arith.constant 0 : index
    %c0_26 = arith.constant 0 : index
    %c0_27 = arith.constant 0 : index
    %50 = vector.load %arg9[%c0_25, %c0_26, %c0_27] : memref<2x8x16xf32, #tpu.memory_space<vmem>>, vector<2x1x16xf32>
    %51 = vector.shape_cast %50 : vector<2x1x16xf32> to vector<2x16xf32>
    %52 = vector.shape_cast %49 : vector<2x16xf32> to vector<2x1x16xf32>
    tpu.vector_store %arg9[%c0_25, %c0_26, %c0_27], %52 {strides = array<i32>} : memref<2x8x16xf32, #tpu.memory_space<vmem>>, vector<2x1x16xf32>,
    %53 = vector.extract_strided_slice %16 {offsets = [0, 1, 0], sizes = [2, 1, 64], strides = [1, 1, 1]} : vector<2x8x64xf32> to vector<2x1x64xf32>
    %54 = vector.shape_cast %53 : vector<2x1x64xf32> to vector<2x64xf32>
    %55 = arith.truncf %49 : vector<2x16xf32> to vector<2x16xbf16>
    %cst_28 = arith.constant dense<0.000000e+00> : vector<2x64xf32>
    %56 = tpu.matmul %55, %17, %cst_28 {dimension_numbers = #tpu.dot_dimension_numbers<[1], [0], [0], [1], [0, 0, 1, 1], [], []>} : vector<2x16xbf16>, vector<16x64xbf16>, vector<2x64xf32> -> vector<2x64xf32>
    %57 = arith.addf %54, %56 : vector<2x64xf32>
    %58 = vector.extract_strided_slice %57 {offsets = [0, 0], sizes = [2, 16], strides = [1, 1]} : vector<2x64xf32> to vector<2x16xf32>
    %59 = arith.negf %58 : vector<2x16xf32>
    %60 = math.exp %59 : vector<2x16xf32>
    %cst_29 = arith.constant 1.000000e+00 : f32
    %61 = vector.broadcast %cst_29 : f32 to vector<2x16xf32>
    %62 = arith.addf %61, %60 : vector<2x16xf32>
    %63 = arith.divf %61, %62 : vector<2x16xf32>
    %64 = vector.extract_strided_slice %57 {offsets = [0, 16], sizes = [2, 16], strides = [1, 1]} : vector<2x64xf32> to vector<2x16xf32>
    %65 = arith.negf %64 : vector<2x16xf32>
    %66 = math.exp %65 : vector<2x16xf32>
    %cst_30 = arith.constant 1.000000e+00 : f32
    %67 = vector.broadcast %cst_30 : f32 to vector<2x16xf32>
    %68 = arith.addf %67, %66 : vector<2x16xf32>
    %69 = arith.divf %67, %68 : vector<2x16xf32>
    %70 = vector.extract_strided_slice %57 {offsets = [0, 32], sizes = [2, 16], strides = [1, 1]} : vector<2x64xf32> to vector<2x16xf32>
    %71 = math.tanh %70 : vector<2x16xf32>
    %72 = vector.extract_strided_slice %57 {offsets = [0, 48], sizes = [2, 16], strides = [1, 1]} : vector<2x64xf32> to vector<2x16xf32>
    %73 = arith.negf %72 : vector<2x16xf32>
    %74 = math.exp %73 : vector<2x16xf32>
    %cst_31 = arith.constant 1.000000e+00 : f32
    %75 = vector.broadcast %cst_31 : f32 to vector<2x16xf32>
    %76 = arith.addf %75, %74 : vector<2x16xf32>
    %77 = arith.divf %75, %76 : vector<2x16xf32>
    %78 = arith.mulf %69, %47 : vector<2x16xf32>
    %79 = arith.mulf %63, %71 : vector<2x16xf32>
    %80 = arith.addf %78, %79 : vector<2x16xf32>
    %81 = math.tanh %80 : vector<2x16xf32>
    %82 = arith.mulf %77, %81 : vector<2x16xf32>
    %c0_32 = arith.constant 0 : index
    %c1 = arith.constant 1 : index
    %c0_33 = arith.constant 0 : index
    %83 = vector.load %arg9[%c0_32, %c1, %c0_33] : memref<2x8x16xf32, #tpu.memory_space<vmem>>, vector<2x1x16xf32>
    %84 = vector.shape_cast %83 : vector<2x1x16xf32> to vector<2x16xf32>
    %85 = vector.shape_cast %82 : vector<2x16xf32> to vector<2x1x16xf32>
    tpu.vector_store %arg9[%c0_32, %c1, %c0_33], %85 {strides = array<i32>} : memref<2x8x16xf32, #tpu.memory_space<vmem>>, vector<2x1x16xf32>,
    %86 = vector.extract_strided_slice %16 {offsets = [0, 2, 0], sizes = [2, 1, 64], strides = [1, 1, 1]} : vector<2x8x64xf32> to vector<2x1x64xf32>
    %87 = vector.shape_cast %86 : vector<2x1x64xf32> to vector<2x64xf32>
    %88 = arith.truncf %82 : vector<2x16xf32> to vector<2x16xbf16>
    %cst_34 = arith.constant dense<0.000000e+00> : vector<2x64xf32>
    %89 = tpu.matmul %88, %17, %cst_34 {dimension_numbers = #tpu.dot_dimension_numbers<[1], [0], [0], [1], [0, 0, 1, 1], [], []>} : vector<2x16xbf16>, vector<16x64xbf16>, vector<2x64xf32> -> vector<2x64xf32>
    %90 = arith.addf %87, %89 : vector<2x64xf32>
    %91 = vector.extract_strided_slice %90 {offsets = [0, 0], sizes = [2, 16], strides = [1, 1]} : vector<2x64xf32> to vector<2x16xf32>
    %92 = arith.negf %91 : vector<2x16xf32>
    %93 = math.exp %92 : vector<2x16xf32>
    %cst_35 = arith.constant 1.000000e+00 : f32
    %94 = vector.broadcast %cst_35 : f32 to vector<2x16xf32>
    %95 = arith.addf %94, %93 : vector<2x16xf32>
    %96 = arith.divf %94, %95 : vector<2x16xf32>
    %97 = vector.extract_strided_slice %90 {offsets = [0, 16], sizes = [2, 16], strides = [1, 1]} : vector<2x64xf32> to vector<2x16xf32>
    %98 = arith.negf %97 : vector<2x16xf32>
    %99 = math.exp %98 : vector<2x16xf32>
    %cst_36 = arith.constant 1.000000e+00 : f32
    %100 = vector.broadcast %cst_36 : f32 to vector<2x16xf32>
    %101 = arith.addf %100, %99 : vector<2x16xf32>
    %102 = arith.divf %100, %101 : vector<2x16xf32>
    %103 = vector.extract_strided_slice %90 {offsets = [0, 32], sizes = [2, 16], strides = [1, 1]} : vector<2x64xf32> to vector<2x16xf32>
    %104 = math.tanh %103 : vector<2x16xf32>
    %105 = vector.extract_strided_slice %90 {offsets = [0, 48], sizes = [2, 16], strides = [1, 1]} : vector<2x64xf32> to vector<2x16xf32>
    %106 = arith.negf %105 : vector<2x16xf32>
    %107 = math.exp %106 : vector<2x16xf32>
    %cst_37 = arith.constant 1.000000e+00 : f32
    %108 = vector.broadcast %cst_37 : f32 to vector<2x16xf32>
    %109 = arith.addf %108, %107 : vector<2x16xf32>
    %110 = arith.divf %108, %109 : vector<2x16xf32>
    %111 = arith.mulf %102, %80 : vector<2x16xf32>
    %112 = arith.mulf %96, %104 : vector<2x16xf32>
    %113 = arith.addf %111, %112 : vector<2x16xf32>
    %114 = math.tanh %113 : vector<2x16xf32>
    %115 = arith.mulf %110, %114 : vector<2x16xf32>
    %c0_38 = arith.constant 0 : index
    %c2 = arith.constant 2 : index
    %c0_39 = arith.constant 0 : index
    %116 = vector.load %arg9[%c0_38, %c2, %c0_39] : memref<2x8x16xf32, #tpu.memory_space<vmem>>, vector<2x1x16xf32>
    %117 = vector.shape_cast %116 : vector<2x1x16xf32> to vector<2x16xf32>
    %118 = vector.shape_cast %115 : vector<2x16xf32> to vector<2x1x16xf32>
    tpu.vector_store %arg9[%c0_38, %c2, %c0_39], %118 {strides = array<i32>} : memref<2x8x16xf32, #tpu.memory_space<vmem>>, vector<2x1x16xf32>,
    %119 = vector.extract_strided_slice %16 {offsets = [0, 3, 0], sizes = [2, 1, 64], strides = [1, 1, 1]} : vector<2x8x64xf32> to vector<2x1x64xf32>
    %120 = vector.shape_cast %119 : vector<2x1x64xf32> to vector<2x64xf32>
    %121 = arith.truncf %115 : vector<2x16xf32> to vector<2x16xbf16>
    %cst_40 = arith.constant dense<0.000000e+00> : vector<2x64xf32>
    %122 = tpu.matmul %121, %17, %cst_40 {dimension_numbers = #tpu.dot_dimension_numbers<[1], [0], [0], [1], [0, 0, 1, 1], [], []>} : vector<2x16xbf16>, vector<16x64xbf16>, vector<2x64xf32> -> vector<2x64xf32>
    %123 = arith.addf %120, %122 : vector<2x64xf32>
    %124 = vector.extract_strided_slice %123 {offsets = [0, 0], sizes = [2, 16], strides = [1, 1]} : vector<2x64xf32> to vector<2x16xf32>
    %125 = arith.negf %124 : vector<2x16xf32>
    %126 = math.exp %125 : vector<2x16xf32>
    %cst_41 = arith.constant 1.000000e+00 : f32
    %127 = vector.broadcast %cst_41 : f32 to vector<2x16xf32>
    %128 = arith.addf %127, %126 : vector<2x16xf32>
    %129 = arith.divf %127, %128 : vector<2x16xf32>
    %130 = vector.extract_strided_slice %123 {offsets = [0, 16], sizes = [2, 16], strides = [1, 1]} : vector<2x64xf32> to vector<2x16xf32>
    %131 = arith.negf %130 : vector<2x16xf32>
    %132 = math.exp %131 : vector<2x16xf32>
    %cst_42 = arith.constant 1.000000e+00 : f32
    %133 = vector.broadcast %cst_42 : f32 to vector<2x16xf32>
    %134 = arith.addf %133, %132 : vector<2x16xf32>
    %135 = arith.divf %133, %134 : vector<2x16xf32>
    %136 = vector.extract_strided_slice %123 {offsets = [0, 32], sizes = [2, 16], strides = [1, 1]} : vector<2x64xf32> to vector<2x16xf32>
    %137 = math.tanh %136 : vector<2x16xf32>
    %138 = vector.extract_strided_slice %123 {offsets = [0, 48], sizes = [2, 16], strides = [1, 1]} : vector<2x64xf32> to vector<2x16xf32>
    %139 = arith.negf %138 : vector<2x16xf32>
    %140 = math.exp %139 : vector<2x16xf32>
    %cst_43 = arith.constant 1.000000e+00 : f32
    %141 = vector.broadcast %cst_43 : f32 to vector<2x16xf32>
    %142 = arith.addf %141, %140 : vector<2x16xf32>
    %143 = arith.divf %141, %142 : vector<2x16xf32>
    %144 = arith.mulf %135, %113 : vector<2x16xf32>
    %145 = arith.mulf %129, %137 : vector<2x16xf32>
    %146 = arith.addf %144, %145 : vector<2x16xf32>
    %147 = math.tanh %146 : vector<2x16xf32>
    %148 = arith.mulf %143, %147 : vector<2x16xf32>
    %c0_44 = arith.constant 0 : index
    %c3 = arith.constant 3 : index
    %c0_45 = arith.constant 0 : index
    %149 = vector.load %arg9[%c0_44, %c3, %c0_45] : memref<2x8x16xf32, #tpu.memory_space<vmem>>, vector<2x1x16xf32>
    %150 = vector.shape_cast %149 : vector<2x1x16xf32> to vector<2x16xf32>
    %151 = vector.shape_cast %148 : vector<2x16xf32> to vector<2x1x16xf32>
    tpu.vector_store %arg9[%c0_44, %c3, %c0_45], %151 {strides = array<i32>} : memref<2x8x16xf32, #tpu.memory_space<vmem>>, vector<2x1x16xf32>,
    %152 = vector.extract_strided_slice %16 {offsets = [0, 4, 0], sizes = [2, 1, 64], strides = [1, 1, 1]} : vector<2x8x64xf32> to vector<2x1x64xf32>
    %153 = vector.shape_cast %152 : vector<2x1x64xf32> to vector<2x64xf32>
    %154 = arith.truncf %148 : vector<2x16xf32> to vector<2x16xbf16>
    %cst_46 = arith.constant dense<0.000000e+00> : vector<2x64xf32>
    %155 = tpu.matmul %154, %17, %cst_46 {dimension_numbers = #tpu.dot_dimension_numbers<[1], [0], [0], [1], [0, 0, 1, 1], [], []>} : vector<2x16xbf16>, vector<16x64xbf16>, vector<2x64xf32> -> vector<2x64xf32>
    %156 = arith.addf %153, %155 : vector<2x64xf32>
    %157 = vector.extract_strided_slice %156 {offsets = [0, 0], sizes = [2, 16], strides = [1, 1]} : vector<2x64xf32> to vector<2x16xf32>
    %158 = arith.negf %157 : vector<2x16xf32>
    %159 = math.exp %158 : vector<2x16xf32>
    %cst_47 = arith.constant 1.000000e+00 : f32
    %160 = vector.broadcast %cst_47 : f32 to vector<2x16xf32>
    %161 = arith.addf %160, %159 : vector<2x16xf32>
    %162 = arith.divf %160, %161 : vector<2x16xf32>
    %163 = vector.extract_strided_slice %156 {offsets = [0, 16], sizes = [2, 16], strides = [1, 1]} : vector<2x64xf32> to vector<2x16xf32>
    %164 = arith.negf %163 : vector<2x16xf32>
    %165 = math.exp %164 : vector<2x16xf32>
    %cst_48 = arith.constant 1.000000e+00 : f32
    %166 = vector.broadcast %cst_48 : f32 to vector<2x16xf32>
    %167 = arith.addf %166, %165 : vector<2x16xf32>
    %168 = arith.divf %166, %167 : vector<2x16xf32>
    %169 = vector.extract_strided_slice %156 {offsets = [0, 32], sizes = [2, 16], strides = [1, 1]} : vector<2x64xf32> to vector<2x16xf32>
    %170 = math.tanh %169 : vector<2x16xf32>
    %171 = vector.extract_strided_slice %156 {offsets = [0, 48], sizes = [2, 16], strides = [1, 1]} : vector<2x64xf32> to vector<2x16xf32>
    %172 = arith.negf %171 : vector<2x16xf32>
    %173 = math.exp %172 : vector<2x16xf32>
    %cst_49 = arith.constant 1.000000e+00 : f32
    %174 = vector.broadcast %cst_49 : f32 to vector<2x16xf32>
    %175 = arith.addf %174, %173 : vector<2x16xf32>
    %176 = arith.divf %174, %175 : vector<2x16xf32>
    %177 = arith.mulf %168, %146 : vector<2x16xf32>
    %178 = arith.mulf %162, %170 : vector<2x16xf32>
    %179 = arith.addf %177, %178 : vector<2x16xf32>
    %180 = math.tanh %179 : vector<2x16xf32>
    %181 = arith.mulf %176, %180 : vector<2x16xf32>
    %c0_50 = arith.constant 0 : index
    %c4 = arith.constant 4 : index
    %c0_51 = arith.constant 0 : index
    %182 = vector.load %arg9[%c0_50, %c4, %c0_51] : memref<2x8x16xf32, #tpu.memory_space<vmem>>, vector<2x1x16xf32>
    %183 = vector.shape_cast %182 : vector<2x1x16xf32> to vector<2x16xf32>
    %184 = vector.shape_cast %181 : vector<2x16xf32> to vector<2x1x16xf32>
    tpu.vector_store %arg9[%c0_50, %c4, %c0_51], %184 {strides = array<i32>} : memref<2x8x16xf32, #tpu.memory_space<vmem>>, vector<2x1x16xf32>,
    %185 = vector.extract_strided_slice %16 {offsets = [0, 5, 0], sizes = [2, 1, 64], strides = [1, 1, 1]} : vector<2x8x64xf32> to vector<2x1x64xf32>
    %186 = vector.shape_cast %185 : vector<2x1x64xf32> to vector<2x64xf32>
    %187 = arith.truncf %181 : vector<2x16xf32> to vector<2x16xbf16>
    %cst_52 = arith.constant dense<0.000000e+00> : vector<2x64xf32>
    %188 = tpu.matmul %187, %17, %cst_52 {dimension_numbers = #tpu.dot_dimension_numbers<[1], [0], [0], [1], [0, 0, 1, 1], [], []>} : vector<2x16xbf16>, vector<16x64xbf16>, vector<2x64xf32> -> vector<2x64xf32>
    %189 = arith.addf %186, %188 : vector<2x64xf32>
    %190 = vector.extract_strided_slice %189 {offsets = [0, 0], sizes = [2, 16], strides = [1, 1]} : vector<2x64xf32> to vector<2x16xf32>
    %191 = arith.negf %190 : vector<2x16xf32>
    %192 = math.exp %191 : vector<2x16xf32>
    %cst_53 = arith.constant 1.000000e+00 : f32
    %193 = vector.broadcast %cst_53 : f32 to vector<2x16xf32>
    %194 = arith.addf %193, %192 : vector<2x16xf32>
    %195 = arith.divf %193, %194 : vector<2x16xf32>
    %196 = vector.extract_strided_slice %189 {offsets = [0, 16], sizes = [2, 16], strides = [1, 1]} : vector<2x64xf32> to vector<2x16xf32>
    %197 = arith.negf %196 : vector<2x16xf32>
    %198 = math.exp %197 : vector<2x16xf32>
    %cst_54 = arith.constant 1.000000e+00 : f32
    %199 = vector.broadcast %cst_54 : f32 to vector<2x16xf32>
    %200 = arith.addf %199, %198 : vector<2x16xf32>
    %201 = arith.divf %199, %200 : vector<2x16xf32>
    %202 = vector.extract_strided_slice %189 {offsets = [0, 32], sizes = [2, 16], strides = [1, 1]} : vector<2x64xf32> to vector<2x16xf32>
    %203 = math.tanh %202 : vector<2x16xf32>
    %204 = vector.extract_strided_slice %189 {offsets = [0, 48], sizes = [2, 16], strides = [1, 1]} : vector<2x64xf32> to vector<2x16xf32>
    %205 = arith.negf %204 : vector<2x16xf32>
    %206 = math.exp %205 : vector<2x16xf32>
    %cst_55 = arith.constant 1.000000e+00 : f32
    %207 = vector.broadcast %cst_55 : f32 to vector<2x16xf32>
    %208 = arith.addf %207, %206 : vector<2x16xf32>
    %209 = arith.divf %207, %208 : vector<2x16xf32>
    %210 = arith.mulf %201, %179 : vector<2x16xf32>
    %211 = arith.mulf %195, %203 : vector<2x16xf32>
    %212 = arith.addf %210, %211 : vector<2x16xf32>
    %213 = math.tanh %212 : vector<2x16xf32>
    %214 = arith.mulf %209, %213 : vector<2x16xf32>
    %c0_56 = arith.constant 0 : index
    %c5 = arith.constant 5 : index
    %c0_57 = arith.constant 0 : index
    %215 = vector.load %arg9[%c0_56, %c5, %c0_57] : memref<2x8x16xf32, #tpu.memory_space<vmem>>, vector<2x1x16xf32>
    %216 = vector.shape_cast %215 : vector<2x1x16xf32> to vector<2x16xf32>
    %217 = vector.shape_cast %214 : vector<2x16xf32> to vector<2x1x16xf32>
    tpu.vector_store %arg9[%c0_56, %c5, %c0_57], %217 {strides = array<i32>} : memref<2x8x16xf32, #tpu.memory_space<vmem>>, vector<2x1x16xf32>,
    %218 = vector.extract_strided_slice %16 {offsets = [0, 6, 0], sizes = [2, 1, 64], strides = [1, 1, 1]} : vector<2x8x64xf32> to vector<2x1x64xf32>
    %219 = vector.shape_cast %218 : vector<2x1x64xf32> to vector<2x64xf32>
    %220 = arith.truncf %214 : vector<2x16xf32> to vector<2x16xbf16>
    %cst_58 = arith.constant dense<0.000000e+00> : vector<2x64xf32>
    %221 = tpu.matmul %220, %17, %cst_58 {dimension_numbers = #tpu.dot_dimension_numbers<[1], [0], [0], [1], [0, 0, 1, 1], [], []>} : vector<2x16xbf16>, vector<16x64xbf16>, vector<2x64xf32> -> vector<2x64xf32>
    %222 = arith.addf %219, %221 : vector<2x64xf32>
    %223 = vector.extract_strided_slice %222 {offsets = [0, 0], sizes = [2, 16], strides = [1, 1]} : vector<2x64xf32> to vector<2x16xf32>
    %224 = arith.negf %223 : vector<2x16xf32>
    %225 = math.exp %224 : vector<2x16xf32>
    %cst_59 = arith.constant 1.000000e+00 : f32
    %226 = vector.broadcast %cst_59 : f32 to vector<2x16xf32>
    %227 = arith.addf %226, %225 : vector<2x16xf32>
    %228 = arith.divf %226, %227 : vector<2x16xf32>
    %229 = vector.extract_strided_slice %222 {offsets = [0, 16], sizes = [2, 16], strides = [1, 1]} : vector<2x64xf32> to vector<2x16xf32>
    %230 = arith.negf %229 : vector<2x16xf32>
    %231 = math.exp %230 : vector<2x16xf32>
    %cst_60 = arith.constant 1.000000e+00 : f32
    %232 = vector.broadcast %cst_60 : f32 to vector<2x16xf32>
    %233 = arith.addf %232, %231 : vector<2x16xf32>
    %234 = arith.divf %232, %233 : vector<2x16xf32>
    %235 = vector.extract_strided_slice %222 {offsets = [0, 32], sizes = [2, 16], strides = [1, 1]} : vector<2x64xf32> to vector<2x16xf32>
    %236 = math.tanh %235 : vector<2x16xf32>
    %237 = vector.extract_strided_slice %222 {offsets = [0, 48], sizes = [2, 16], strides = [1, 1]} : vector<2x64xf32> to vector<2x16xf32>
    %238 = arith.negf %237 : vector<2x16xf32>
    %239 = math.exp %238 : vector<2x16xf32>
    %cst_61 = arith.constant 1.000000e+00 : f32
    %240 = vector.broadcast %cst_61 : f32 to vector<2x16xf32>
    %241 = arith.addf %240, %239 : vector<2x16xf32>
    %242 = arith.divf %240, %241 : vector<2x16xf32>
    %243 = arith.mulf %234, %212 : vector<2x16xf32>
    %244 = arith.mulf %228, %236 : vector<2x16xf32>
    %245 = arith.addf %243, %244 : vector<2x16xf32>
    %246 = math.tanh %245 : vector<2x16xf32>
    %247 = arith.mulf %242, %246 : vector<2x16xf32>
    %c0_62 = arith.constant 0 : index
    %c6 = arith.constant 6 : index
    %c0_63 = arith.constant 0 : index
    %248 = vector.load %arg9[%c0_62, %c6, %c0_63] : memref<2x8x16xf32, #tpu.memory_space<vmem>>, vector<2x1x16xf32>
    %249 = vector.shape_cast %248 : vector<2x1x16xf32> to vector<2x16xf32>
    %250 = vector.shape_cast %247 : vector<2x16xf32> to vector<2x1x16xf32>
    tpu.vector_store %arg9[%c0_62, %c6, %c0_63], %250 {strides = array<i32>} : memref<2x8x16xf32, #tpu.memory_space<vmem>>, vector<2x1x16xf32>,
    %251 = vector.extract_strided_slice %16 {offsets = [0, 7, 0], sizes = [2, 1, 64], strides = [1, 1, 1]} : vector<2x8x64xf32> to vector<2x1x64xf32>
    %252 = vector.shape_cast %251 : vector<2x1x64xf32> to vector<2x64xf32>
    %253 = arith.truncf %247 : vector<2x16xf32> to vector<2x16xbf16>
    %cst_64 = arith.constant dense<0.000000e+00> : vector<2x64xf32>
    %254 = tpu.matmul %253, %17, %cst_64 {dimension_numbers = #tpu.dot_dimension_numbers<[1], [0], [0], [1], [0, 0, 1, 1], [], []>} : vector<2x16xbf16>, vector<16x64xbf16>, vector<2x64xf32> -> vector<2x64xf32>
    %255 = arith.addf %252, %254 : vector<2x64xf32>
    %256 = vector.extract_strided_slice %255 {offsets = [0, 0], sizes = [2, 16], strides = [1, 1]} : vector<2x64xf32> to vector<2x16xf32>
    %257 = arith.negf %256 : vector<2x16xf32>
    %258 = math.exp %257 : vector<2x16xf32>
    %cst_65 = arith.constant 1.000000e+00 : f32
    %259 = vector.broadcast %cst_65 : f32 to vector<2x16xf32>
    %260 = arith.addf %259, %258 : vector<2x16xf32>
    %261 = arith.divf %259, %260 : vector<2x16xf32>
    %262 = vector.extract_strided_slice %255 {offsets = [0, 16], sizes = [2, 16], strides = [1, 1]} : vector<2x64xf32> to vector<2x16xf32>
    %263 = arith.negf %262 : vector<2x16xf32>
    %264 = math.exp %263 : vector<2x16xf32>
    %cst_66 = arith.constant 1.000000e+00 : f32
    %265 = vector.broadcast %cst_66 : f32 to vector<2x16xf32>
    %266 = arith.addf %265, %264 : vector<2x16xf32>
    %267 = arith.divf %265, %266 : vector<2x16xf32>
    %268 = vector.extract_strided_slice %255 {offsets = [0, 32], sizes = [2, 16], strides = [1, 1]} : vector<2x64xf32> to vector<2x16xf32>
    %269 = math.tanh %268 : vector<2x16xf32>
    %270 = vector.extract_strided_slice %255 {offsets = [0, 48], sizes = [2, 16], strides = [1, 1]} : vector<2x64xf32> to vector<2x16xf32>
    %271 = arith.negf %270 : vector<2x16xf32>
    %272 = math.exp %271 : vector<2x16xf32>
    %cst_67 = arith.constant 1.000000e+00 : f32
    %273 = vector.broadcast %cst_67 : f32 to vector<2x16xf32>
    %274 = arith.addf %273, %272 : vector<2x16xf32>
    %275 = arith.divf %273, %274 : vector<2x16xf32>
    %276 = arith.mulf %267, %245 : vector<2x16xf32>
    %277 = arith.mulf %261, %269 : vector<2x16xf32>
    %278 = arith.addf %276, %277 : vector<2x16xf32>
    %279 = math.tanh %278 : vector<2x16xf32>
    %280 = arith.mulf %275, %279 : vector<2x16xf32>
    %c0_68 = arith.constant 0 : index
    %c7 = arith.constant 7 : index
    %c0_69 = arith.constant 0 : index
    %281 = vector.load %arg9[%c0_68, %c7, %c0_69] : memref<2x8x16xf32, #tpu.memory_space<vmem>>, vector<2x1x16xf32>
    %282 = vector.shape_cast %281 : vector<2x1x16xf32> to vector<2x16xf32>
    %283 = vector.shape_cast %280 : vector<2x16xf32> to vector<2x1x16xf32>
    tpu.vector_store %arg9[%c0_68, %c7, %c0_69], %283 {strides = array<i32>} : memref<2x8x16xf32, #tpu.memory_space<vmem>>, vector<2x1x16xf32>,
    %c0_70 = arith.constant 0 : index
    %c0_71 = arith.constant 0 : index
    %284 = vector.load %arg10[%c0_70, %c0_71] : memref<2x16xf32, #tpu.memory_space<vmem>>, vector<2x16xf32>
    tpu.vector_store %arg10[%c0_70, %c0_71], %280 {strides = array<i32>} : memref<2x16xf32, #tpu.memory_space<vmem>>, vector<2x16xf32>,
    %c0_72 = arith.constant 0 : index
    %c0_73 = arith.constant 0 : index
    %285 = vector.load %arg11[%c0_72, %c0_73] : memref<2x16xf32, #tpu.memory_space<vmem>>, vector<2x16xf32>
    tpu.vector_store %arg11[%c0_72, %c0_73], %278 {strides = array<i32>} : memref<2x16xf32, #tpu.memory_space<vmem>>, vector<2x16xf32>,
    %c8_i32 = arith.constant 8 : i32
    %286 = arith.muli %arg1, %c8_i32 : i32
    %287 = tpu.iota {dimensions = array<i32: 1>} : vector<2x8xi32>
    %288 = vector.broadcast %286 : i32 to vector<2x8xi32>
    %289 = arith.addi %288, %287 : vector<2x8xi32>
    %290 = vector.broadcast %4 : vector<2x1xi32> to vector<2x8xi32>
    %291 = arith.cmpi slt, %289, %290 : vector<2x8xi32>
    %292 = arith.extui %291 : vector<2x8xi1> to vector<2x8xi32>
    %293 = arith.sitofp %292 : vector<2x8xi32> to vector<2x8xf32>
    %294 = vector.shape_cast %293 : vector<2x8xf32> to vector<2x8x1xf32>
    %c0_74 = arith.constant 0 : index
    %c0_75 = arith.constant 0 : index
    %c0_76 = arith.constant 0 : index
    %295 = vector.load %arg9[%c0_74, %c0_75, %c0_76] : memref<2x8x16xf32, #tpu.memory_space<vmem>>, vector<2x8x16xf32>
    %296 = vector.broadcast %294 : vector<2x8x1xf32> to vector<2x8x16xf32>
    %297 = arith.mulf %295, %296 : vector<2x8x16xf32>
    %298 = arith.addf %297, %0 : vector<2x8x16xf32>
    %cst_77 = arith.constant dense<0.000000e+00> : vector<2x8xf32>
    %299 = vector.multi_reduction <add>, %298, %cst_77 [2] : vector<2x8x16xf32> to vector<2x8xf32>
    %300 = vector.shape_cast %299 : vector<2x8xf32> to vector<2x8x1xf32>
    %cst_78 = arith.constant 1.600000e+01 : f32
    %301 = vector.broadcast %cst_78 : f32 to vector<2x8x1xf32>
    %302 = arith.divf %300, %301 : vector<2x8x1xf32>
    %303 = vector.broadcast %302 : vector<2x8x1xf32> to vector<2x8x16xf32>
    %304 = arith.subf %298, %303 : vector<2x8x16xf32>
    %305 = arith.mulf %304, %304 : vector<2x8x16xf32>
    %cst_79 = arith.constant dense<0.000000e+00> : vector<2x8xf32>
    %306 = vector.multi_reduction <add>, %305, %cst_79 [2] : vector<2x8x16xf32> to vector<2x8xf32>
    %307 = vector.shape_cast %306 : vector<2x8xf32> to vector<2x8x1xf32>
    %cst_80 = arith.constant 1.600000e+01 : f32
    %308 = vector.broadcast %cst_80 : f32 to vector<2x8x1xf32>
    %309 = arith.divf %307, %308 : vector<2x8x1xf32>
    %310 = vector.broadcast %302 : vector<2x8x1xf32> to vector<2x8x16xf32>
    %311 = arith.subf %298, %310 : vector<2x8x16xf32>
    %cst_81 = arith.constant 9.99999974E-6 : f32
    %312 = vector.broadcast %cst_81 : f32 to vector<2x8x1xf32>
    %313 = arith.addf %309, %312 : vector<2x8x1xf32>
    %314 = math.rsqrt %313 : vector<2x8x1xf32>
    %315 = vector.broadcast %314 : vector<2x8x1xf32> to vector<2x8x16xf32>
    %316 = arith.mulf %311, %315 : vector<2x8x16xf32>
    %317 = vector.broadcast %5 : vector<1x1x16xf32> to vector<2x8x16xf32>
    %318 = arith.mulf %316, %317 : vector<2x8x16xf32>
    %319 = vector.broadcast %6 : vector<1x1x16xf32> to vector<2x8x16xf32>
    %320 = arith.addf %318, %319 : vector<2x8x16xf32>
    %321 = vector.broadcast %294 : vector<2x8x1xf32> to vector<2x8x16xf32>
    %322 = arith.mulf %320, %321 : vector<2x8x16xf32>
    %c0_82 = arith.constant 0 : index
    %c0_83 = arith.constant 0 : index
    %c0_84 = arith.constant 0 : index
    %323 = vector.load %arg9[%c0_82, %c0_83, %c0_84] : memref<2x8x16xf32, #tpu.memory_space<vmem>>, vector<2x8x16xf32>
    tpu.vector_store %arg9[%c0_82, %c0_83, %c0_84], %322 {strides = array<i32>} : memref<2x8x16xf32, #tpu.memory_space<vmem>>, vector<2x8x16xf32>,
    return
  }
  func.func @transform_0(%arg0: i32, %arg1: i32) -> (i32, i32, i32) {
    %c0_i32 = arith.constant 0 : i32
    %c0_i32_0 = arith.constant 0 : i32
    return %arg0, %arg1, %c0_i32 : i32, i32, i32
  }
  func.func @transform_1(%arg0: i32, %arg1: i32) -> (i32, i32) {
    %c0_i32 = arith.constant 0 : i32
    %c0_i32_0 = arith.constant 0 : i32
    %c0_i32_1 = arith.constant 0 : i32
    return %c0_i32, %c0_i32_0 : i32, i32
  }
  func.func @transform_2(%arg0: i32, %arg1: i32) -> (i32, i32) {
    %c0_i32 = arith.constant 0 : i32
    %c0_i32_0 = arith.constant 0 : i32
    %c0_i32_1 = arith.constant 0 : i32
    return %c0_i32, %c0_i32_0 : i32, i32
  }
  func.func @transform_3(%arg0: i32, %arg1: i32) -> (i32, i32) {
    %c0_i32 = arith.constant 0 : i32
    %c0_i32_0 = arith.constant 0 : i32
    %c0_i32_1 = arith.constant 0 : i32
    return %c0_i32, %c0_i32_0 : i32, i32
  }
  func.func @transform_4(%arg0: i32, %arg1: i32) -> (i32, i32) {
    %c0_i32 = arith.constant 0 : i32
    %c0_i32_0 = arith.constant 0 : i32
    return %arg0, %c0_i32 : i32, i32
  }
  func.func @transform_5(%arg0: i32, %arg1: i32) -> (i32, i32, i32) {
    %c0_i32 = arith.constant 0 : i32
    %c0_i32_0 = arith.constant 0 : i32
    %c0_i32_1 = arith.constant 0 : i32
    %c0_i32_2 = arith.constant 0 : i32
    return %c0_i32, %c0_i32_0, %c0_i32_1 : i32, i32, i32
  }
  func.func @transform_6(%arg0: i32, %arg1: i32) -> (i32, i32, i32) {
    %c0_i32 = arith.constant 0 : i32
    %c0_i32_0 = arith.constant 0 : i32
    %c0_i32_1 = arith.constant 0 : i32
    %c0_i32_2 = arith.constant 0 : i32
    return %c0_i32, %c0_i32_0, %c0_i32_1 : i32, i32, i32
  }
  func.func @transform_7(%arg0: i32, %arg1: i32) -> (i32, i32, i32) {
    %c0_i32 = arith.constant 0 : i32
    %c0_i32_0 = arith.constant 0 : i32
    return %arg0, %arg1, %c0_i32 : i32, i32, i32
  }
}

</mosaic_0001>

<bundles_post_ra>
// kernel: tpu_custom_call.1
= control target key start
LH: loop header
LB: loop body
LE: loop exit
PB: predicated region body
PF: predicated region fallthrough
CT: control target
= control target key end

     0   :  { %12 = vsyncpa [#allocation5], 0  ;;  %s1952_s0 = inlined_call_operand.hbm [shape: f32[2,8,16], index: 0, kind: input, shape index: {}]   ;;  %s1953_s1 = inlined_call_operand.hbm [shape: f32[16,64], index: 1, kind: input, shape index: {}]   ;;  %s1954_s2 = inlined_call_operand.vmem [shape: f32[1,64], index: 2, kind: input, shape index: {}]   ;;  %s1955_s3 = inlined_call_operand.hbm [shape: f32[16,64], index: 3, kind: input, shape index: {}]   ;;  %s1956_s4 = inlined_call_operand.vmem [shape: s32[2,1], index: 4, kind: input, shape index: {}]   ;;  %s1957_s5 = inlined_call_operand.vmem [shape: f32[1,1,16], index: 5, kind: input, shape index: {}]   ;;  %s1958_s6 = inlined_call_operand.vmem [shape: f32[1,1,16], index: 6, kind: input, shape index: {}]   ;;  %s1959_s7 = inlined_call_operand.hbm [shape: f32[2,8,16], index: 7, kind: output, shape index: {}]  }
   0x1   :  { %13 = vsyncpa [#allocation8], 0 }
   0x2   :  { %14 = vsyncpa [#allocation6], 0  ;;  %s1596_s24 = smov [#allocation7]   ;;  %s1597_s26 = smov [#allocation4]  }
   0x3   :  { %s32_s25 = sshll.u32 %s1596_s24, 4  ;;  %s20_s27 = sshll.u32 %s1597_s26, 4  ;;  %s33_s25 = int_to_ptr.vmem [resolvable:$true] %s32_s25  ;;  %s21_s27 = int_to_ptr.vmem [resolvable:$true] %s20_s27 }
   0x4   :  { %s1518_s28 = scalar_lea.vmem %s33_s25, 256  ;;  %p1523_p1 = scmp.lt.s32.totalorder %s33_s25, %s33_s25 }
   0x5   :  { %p1519_p0 = scmp.ne.s32.totalorder %s33_s25, %s1518_s28  ;;  %p1524_p2 = scmp.lt.s32.totalorder %s1518_s28, %s1518_s28 }
   0x7   :  { %p1525_p3 = por %p1524_p2, %p1523_p1 }
   0x9   :  { %p1526_p4 = pnand %p1525_p3, %p1519_p0 }
   0xb   :  { %1529 = shalt.err (!%p1526_p4)
}
   0xc   :  { %s1598_s29 = smov 128   ;;  %s1599_s30 = smov 8  }
   0xd   :  { %38 = dma.hbm_to_vmem [thread:$0]  %s1953_s1, 256, %s33_s25, [#allocation8], %s1598_s29, %s1598_s29, %s1599_s30  }
   0xe   :  { %s1538_s10 = scalar_lea.vmem %s21_s27, 256  ;;  %p1543_p6 = scmp.lt.s32.totalorder %s21_s27, %s21_s27 }
   0xf   :  { %p1539_p5 = scmp.ne.s32.totalorder %s21_s27, %s1538_s10  ;;  %p1544_p7 = scmp.lt.s32.totalorder %s1538_s10, %s1538_s10 }
  0x11   :  { %p1545_p8 = por %p1544_p7, %p1543_p6 }
  0x13   :  { %p1546_p9 = pnand %p1545_p8, %p1539_p5 }
  0x15   :  { %1549 = shalt.err (!%p1546_p9)
}
  0x16   :  { %26 = dma.hbm_to_vmem [thread:$0]  %s1952_s0, 256, %s21_s27, [#allocation5], %s1598_s29, %s1598_s29, %s1599_s30  }
  0x17   :  { %s1600_s13 = smov [#allocation9]  }
  0x18   :  { %s46_s14 = sshll.u32 %s1600_s13, 4  ;;  %s47_s14 = int_to_ptr.vmem [resolvable:$true] %s46_s14 }
  0x19   :  { %s1558_s15 = scalar_lea.vmem %s47_s14, 256  ;;  %p1563_p11 = scmp.lt.s32.totalorder %s47_s14, %s47_s14 }
  0x1a   :  { %p1559_p10 = scmp.ne.s32.totalorder %s47_s14, %s1558_s15  ;;  %p1564_p12 = scmp.lt.s32.totalorder %s1558_s15, %s1558_s15 }
  0x1c   :  { %p1565_p13 = por %p1564_p12, %p1563_p11 }
  0x1e   :  { %p1566_p0 = pnand %p1565_p13, %p1559_p10 }
  0x20   :  { %1569 = shalt.err (!%p1566_p0)
}
  0x21   :  { %52 = dma.hbm_to_vmem [thread:$0]  %s1955_s3, 256, %s47_s14, [#allocation8], %s1598_s29, %s1598_s29, %s1599_s30  }
  0x22   :  { %1590 = dma.done.wait [#allocation5], 256  }
  0x23   :  { %1591 = vsyncadd [#allocation5], 4294967040 }
  0x24   :  { %1592 = dma.done.wait [#allocation8], 512  }
  0x25   :  { %1593 = vsyncadd [#allocation8], 4294966784  ;;  %vm83_vm0 = vcmask 123904   ;;  %v1601_v0 = vmov 0.0   ;;  %vm1602_vm1 = vmmov 0   ;;  %v71_v1 = vld [vmem:[#allocation7] sm:$0xff] }
  0x26   :  { %1306 = vmatprep.subr.bf16.mxu0 %v1601_v0  ;;  %1312 = vmatprep.subr.bf16.mxu1 %v1601_v0  ;;  %84 = vst.msk [vmem:[#allocation2] sm:$0x3] %vm83_vm0, %v1601_v0  ;;  %85 = vst.msk [vmem:[#allocation3] sm:$0x3] %vm83_vm0, %v1601_v0  ;;  %v72_v2 = vld [vmem:[#allocation7 + $0x8] sm:$0xff]  ;;  %v74_v3 = vld [vmem:[#allocation9] sm:$0xff] }
  0x27   :  { %1308 = vmatprep.mubr.msk.bf16.mxu0 %vm1602_vm1, %v1601_v0  ;;  %1314 = vmatprep.mubr.msk.bf16.mxu1 %vm1602_vm1, %v1601_v0  ;;  %v87_v4 = vpack.c.bf16 %v72_v2, %v71_v1  ;;  %v75_v5 = vld [vmem:[#allocation9 + $0x8] sm:$0xff]  ;;  %v69_v6 = vld [vmem:[#allocation4] sm:$0xff]  ;;  %vm94_vm2 = vcmask 130048   ;;  %s1603_s0 = smov 16   ;;  %v1259_v16 = vld [vmem:[%s1954_s2] ss:$0 sm:$0xff] }
  0x28   :  { %v70_v7 = vld [vmem:[#allocation4 + $0x8] sm:$0xff]  ;;  %v1676_v8 = vpack.c.bf16 %v75_v5, %v74_v3  ;;  %s1604_s18 = smov 96   ;;  %s1605_s2 = smov 32   ;;  %vm266_vm3 = vcmask 1041409   ;;  %vm256_vm4 = vcmask 122880   ;;  %vm382_vm5 = vcmask 123905  }
  0x29   :  { %v86_v9 = vpack.c.bf16 %v70_v7, %v69_v6  ;;  %1307 = vmatpush3.bf16.msra.mxu0 %v87_v4  ;;  %s1606_s19 = smov 80   ;;  %vm508_vm6 = vcmask 124930   ;;  %vm635_vm8 = vcmask 125955   ;;  %vm762_vm9 = vcmask 126980   ;;  %s1609_s26 = smov [#allocation10]  }
  0x2a   :  { %1313 = vmatpush3.bf16.msra.mxu1 %v1676_v8  ;;  %1318 = vmatprep.subr.bf16.mxu0 %v1601_v0  ;;  %vm889_vm10 = vcmask 128005   ;;  %vm1016_vm11 = vcmask 129030   ;;  %vm1143_vm12 = vcmask 130055   ;;  %s1246_s27 = sshll.u32 %s1609_s26, 4  ;;  %s1247_s27 = int_to_ptr.vmem [resolvable:$true] %s1246_s27 }
  0x2b   :  { %1324 = vmatprep.subr.bf16.mxu1 %v1601_v0  ;;  %p1575_p2 = scmp.lt.s32.totalorder %s1247_s27, %s1247_s27 }
  0x2c   :  { %1309 = vmatmul.mubr.msk.bf16.vlgmr.msra.gmra.mxu0 %vm94_vm2, %v86_v9 }
  0x2d   :  { %v140_v10 = vld [vmem:[#allocation2] sm:$0x3]  ;;  %v141_v11 = vld [vmem:[#allocation3] sm:$0x3]  ;;  %1319 = vmatpush3.bf16.msra.mxu0 %v1676_v8  ;;  %1320 = vmatprep.mubr.msk.bf16.mxu0 %vm1602_vm1, %v1601_v0 }
  0x2e   :  { %v142_v12 = vpack.c.bf16 %v140_v10, %v140_v10  ;;  %v207_v13 = vrot.slane %v141_v11, 1  ;;  %1330 = vmatprep.subr.bf16.mxu0 %v1601_v0 }
  0x30   :  { %210 = vrot.lane.b32.xlu1 %v207_v13, %s1603_s0  ;;  %1315 = vmatmul.mubr.msk.bf16.vlgmr.msra.gmra.mxu1 %vm94_vm2, %v142_v12 }
  0x31   :  { %1325 = vmatpush3.bf16.msra.mxu1 %v1676_v8  ;;  %1326 = vmatprep.mubr.msk.bf16.mxu1 %vm1602_vm1, %v1601_v0 }
  0x32   :  { %1336 = vmatprep.subr.bf16.mxu1 %v1601_v0 }
  0x34   :  { %208 = vrot.lane.b32.xlu1 %v141_v11, %s1603_s0 }
  0xa2   :  { %v211_v42 = vpop.permute.xlu1 %210 }
  0xa6   :  { %v209_v44 = vpop.permute.xlu1 %208 }
  0xec   :  { %v132_v14 = vpop.f32.mrf.mxu0 }
  0xed   :  { %v1696_v21 = vadd.f32 %v1259_v16, %v132_v14 }
  0xee   :  { %v1310_v17 = vpop.f32.mrf.mxu0 }
  0xf0   :  { %v180_v15 = vpop.f32.mrf.mxu1  ;;  %v135_v20 = vpop.f32.mrf.mxu0 }
  0xf1   :  { %v187_v18 = vrot.slane %v180_v15, 1  ;;  %v1698_v22 = vadd.f32 %v1259_v16, %v135_v20  ;;  %v190_v27 = vadd.f32 %v180_v15, %v1696_v21 }
  0xf2   :  { %v1316_v19 = vpop.f32.mrf.mxu1  ;;  %v1311_v24 = vpop.f32.mrf.mxu0 }
  0xf3   :  { %v191_v26 = vadd.f32 %v187_v18, %v1698_v22  ;;  %v1262_v31 = vmul.f32 -1.442695, %v190_v27 }
  0xf4   :  { %v183_v23 = vpop.f32.mrf.mxu1 }
  0xf5   :  { %1376 = vtanh.f32 %v191_v26  ;;  %v1263_v30 = vmul.f32 -1.442695, %v191_v26 }
  0xf6   :  { %v1317_v25 = vpop.f32.mrf.mxu1  ;;  %1378 = vtanh.f32 %v190_v27 }
  0xf7   :  { %1380 = vpow2.f32 %v1263_v30 }
  0xf8   :  { %1382 = vpow2.f32 %v1262_v31 }
 0x102   :  { %v1377_v28 = vpop.eup %1376 }
 0x103   :  { %220 = vrot.lane.b32.xlu0 %v1377_v28, %s1604_s18  ;;  %v1379_v29 = vpop.eup %1378 }
 0x104   :  { %v1381_v32 = vpop.eup %1380 }
 0x105   :  { %v199_v33 = vadd.f32 1.0, %v1381_v32  ;;  %v1383_v34 = vpop.eup %1382 }
 0x106   :  { %v198_v35 = vadd.f32 1.0, %v1383_v34 }
 0x107   :  { %218 = vrot.lane.b32.xlu0 %v1379_v29, %s1604_s18  ;;  %1384 = vrcp.f32 %v199_v33 }
 0x108   :  { %1386 = vrcp.f32 %v198_v35 }
 0x114   :  { %v1385_v36 = vpop.eup %1384 }
 0x115   :  { %v1387_v39 = vpop.eup %1386  ;;  %v215_v43 = vmul.f32 %v1385_v36, %v211_v42 }
 0x116   :  { %v214_v47 = vmul.f32 %v1387_v39, %v209_v44 }
 0x175   :  { %v221_v37 = vpop.permute.xlu0 %220 }
 0x176   :  { %v225_v38 = vmul.f32 %v1385_v36, %v221_v37 }
 0x178   :  { %230 = vrot.lane.b32.xlu0 %v225_v38, %s1603_s0 }
 0x179   :  { %v219_v40 = vpop.permute.xlu0 %218 }
 0x17a   :  { %v224_v41 = vmul.f32 %v1387_v39, %v219_v40 }
 0x17c   :  { %228 = vrot.lane.b32.xlu1 %v224_v41, %s1603_s0 }
 0x1ea   :  { %v231_v45 = vpop.permute.xlu0 %230 }
 0x1eb   :  { %v1706_v46 = vadd.f32 %v231_v45, %v215_v43 }
 0x1ed   :  { %1388 = vtanh.f32 %v1706_v46  ;;  %v337_v25 = vrot.slane %v1706_v46, 7 }
 0x1ee   :  { %v229_v48 = vpop.permute.xlu1 %228 }
 0x1ef   :  { %v1709_v49 = vadd.f32 %v229_v48, %v214_v47 }
 0x1f1   :  { %1390 = vtanh.f32 %v1709_v49  ;;  %v336_v27 = vrot.slane %v1709_v49, 7 }
 0x1fa   :  { %v1389_v50 = vpop.eup %1388 }
 0x1fb   :  { %242 = vrot.lane.b32.xlu0 %v1389_v50, %s1605_s2 }
 0x1fe   :  { %v1391_v51 = vpop.eup %1390 }
 0x1ff   :  { %240 = vrot.lane.b32.xlu1 %v1391_v51, %s1605_s2 }
 0x26d   :  { %v243_v52 = vpop.permute.xlu0 %242 }
 0x26e   :  { %v1714_v53 = vmul.f32 %v1385_v36, %v243_v52 }
 0x270   :  { %v260_v54 = vpack.c.bf16 %v1714_v53, %v1714_v53 }
 0x271   :  { %v241_v55 = vpop.permute.xlu1 %240 }
 0x272   :  { %v264_v56 = vunpack.c.l.b16 %v260_v54  ;;  %v1718_v57 = vmul.f32 %v1387_v39, %v241_v55 }
 0x274   :  { %v259_v58 = vpack.c.bf16 %v1718_v57, %v1718_v57  ;;  %v265_v59 = vrot.slane %v264_v56, 7 }
 0x276   :  { %v263_v60 = vunpack.c.l.b16 %v259_v58 }
 0x278   :  { %v267_v61 = vsel %vm266_vm3, %v265_v59, %v263_v60 }
 0x279   :  { %v268_v62 = vpack.c.b16 %v267_v61, %v267_v61 }
 0x27b   :  { %269 = vrot.lane.b32.xlu0 %v268_v62, %s1606_s19 }
 0x2ed   :  { %v270_v63 = vpop.permute.xlu0 %269 }
 0x2ee   :  { %1321 = vmatmul.mubr.msk.bf16.vlgmr.msra.gmra.mxu0 %vm94_vm2, %v270_v63 }
 0x2ef   :  { %1331 = vmatpush3.bf16.msra.mxu0 %v1676_v8  ;;  %1332 = vmatprep.mubr.msk.bf16.mxu0 %vm1602_vm1, %v1601_v0 }
 0x2f0   :  { %1342 = vmatprep.subr.bf16.mxu0 %v1601_v0 }
 0x3ae   :  { %v308_v1 = vpop.f32.mrf.mxu0 }
 0x3af   :  { %v315_v2 = vrot.slane %v308_v1, 7  ;;  %v319_v3 = vadd.f32 %v308_v1, %v1698_v22 }
 0x3b0   :  { %v1322_v4 = vpop.f32.mrf.mxu0 }
 0x3b1   :  { %v318_v5 = vadd.f32 %v315_v2, %v1696_v21  ;;  %1392 = vtanh.f32 %v319_v3  ;;  %v1266_v11 = vmul.f32 -1.442695, %v319_v3 }
 0x3b2   :  { %v311_v6 = vpop.f32.mrf.mxu0 }
 0x3b3   :  { %1394 = vtanh.f32 %v318_v5  ;;  %v1265_v12 = vmul.f32 -1.442695, %v318_v5 }
 0x3b4   :  { %v1323_v7 = vpop.f32.mrf.mxu0  ;;  %1396 = vpow2.f32 %v1266_v11 }
 0x3b5   :  { %1398 = vpow2.f32 %v1265_v12 }
 0x3be   :  { %v1393_v9 = vpop.eup %1392 }
 0x3bf   :  { %346 = vrot.lane.b32.xlu0 %v1393_v9, %s1604_s18 }
 0x3c0   :  { %v1395_v10 = vpop.eup %1394 }
 0x3c1   :  { %344 = vrot.lane.b32.xlu1 %v1395_v10, %s1604_s18  ;;  %v1397_v13 = vpop.eup %1396 }
 0x3c2   :  { %v1399_v14 = vpop.eup %1398  ;;  %v327_v15 = vadd.f32 1.0, %v1397_v13 }
 0x3c3   :  { %v326_v16 = vadd.f32 1.0, %v1399_v14 }
 0x3c4   :  { %1400 = vrcp.f32 %v327_v15 }
 0x3c5   :  { %1402 = vrcp.f32 %v326_v16 }
 0x3d1   :  { %v1401_v17 = vpop.eup %1400 }
 0x3d2   :  { %v1403_v20 = vpop.eup %1402  ;;  %v341_v26 = vmul.f32 %v1401_v17, %v337_v25 }
 0x3d3   :  { %v340_v30 = vmul.f32 %v1403_v20, %v336_v27 }
 0x431   :  { %v347_v18 = vpop.permute.xlu0 %346 }
 0x432   :  { %v351_v19 = vmul.f32 %v1401_v17, %v347_v18 }
 0x433   :  { %v345_v23 = vpop.permute.xlu1 %344 }
 0x434   :  { %356 = vrot.lane.b32.xlu0 %v351_v19, %s1603_s0  ;;  %v350_v24 = vmul.f32 %v1403_v20, %v345_v23 }
 0x436   :  { %354 = vrot.lane.b32.xlu1 %v350_v24, %s1603_s0 }
 0x4a6   :  { %v357_v28 = vpop.permute.xlu0 %356 }
 0x4a7   :  { %v1737_v29 = vadd.f32 %v357_v28, %v341_v26 }
 0x4a8   :  { %v355_v31 = vpop.permute.xlu1 %354 }
 0x4a9   :  { %1404 = vtanh.f32 %v1737_v29  ;;  %v360_v32 = vadd.f32 %v355_v31, %v340_v30  ;;  %v463_v10 = vrot.slane %v1737_v29, 7 }
 0x4ab   :  { %1406 = vtanh.f32 %v360_v32  ;;  %v462_v9 = vrot.slane %v360_v32, 7 }
 0x4b6   :  { %v1405_v33 = vpop.eup %1404 }
 0x4b7   :  { %368 = vrot.lane.b32.xlu0 %v1405_v33, %s1605_s2 }
 0x4b8   :  { %v1407_v34 = vpop.eup %1406 }
 0x4b9   :  { %366 = vrot.lane.b32.xlu1 %v1407_v34, %s1605_s2 }
 0x529   :  { %v369_v35 = vpop.permute.xlu0 %368 }
 0x52a   :  { %v1742_v36 = vmul.f32 %v1401_v17, %v369_v35 }
 0x52b   :  { %v367_v37 = vpop.permute.xlu1 %366 }
 0x52c   :  { %v1744_v38 = vmul.f32 %v1403_v20, %v367_v37  ;;  %v386_v39 = vpack.c.bf16 %v1742_v36, %v1742_v36 }
 0x52e   :  { %v385_v40 = vpack.c.bf16 %v1744_v38, %v1744_v38  ;;  %v390_v42 = vunpack.c.l.b16 %v386_v39 }
 0x530   :  { %v389_v41 = vunpack.c.l.b16 %v385_v40 }
 0x532   :  { %v391_v43 = vrot.slane %v389_v41, 1 }
 0x534   :  { %v392_v44 = vsel %vm266_vm3, %v390_v42, %v391_v43 }
 0x535   :  { %v393_v45 = vpack.c.b16 %v392_v44, %v392_v44 }
 0x537   :  { %394 = vrot.lane.b32.xlu1 %v393_v45, %s1606_s19 }
 0x5a9   :  { %v395_v46 = vpop.permute.xlu1 %394 }
 0x5aa   :  { %1327 = vmatmul.mubr.msk.bf16.vlgmr.msra.gmra.mxu1 %vm94_vm2, %v395_v46 }
 0x5ab   :  { %1337 = vmatpush3.bf16.msra.mxu1 %v1676_v8  ;;  %1338 = vmatprep.mubr.msk.bf16.mxu1 %vm1602_vm1, %v1601_v0 }
 0x5ac   :  { %1348 = vmatprep.subr.bf16.mxu1 %v1601_v0 }
 0x66a   :  { %v433_v47 = vpop.f32.mrf.mxu1 }
 0x66b   :  { %v440_v48 = vrot.slane %v433_v47, 6  ;;  %v441_v49 = vrot.slane %v433_v47, 7 }
 0x66c   :  { %v1328_v50 = vpop.f32.mrf.mxu1 }
 0x66d   :  { %v444_v51 = vadd.f32 %v440_v48, %v1696_v21  ;;  %v445_v52 = vadd.f32 %v441_v49, %v1698_v22 }
 0x66e   :  { %v436_v54 = vpop.f32.mrf.mxu1 }
 0x66f   :  { %1408 = vtanh.f32 %v444_v51  ;;  %v1268_v59 = vmul.f32 -1.442695, %v444_v51  ;;  %v1269_v60 = vmul.f32 -1.442695, %v445_v52 }
 0x670   :  { %1410 = vtanh.f32 %v445_v52  ;;  %v1329_v55 = vpop.f32.mrf.mxu1 }
 0x671   :  { %1412 = vpow2.f32 %v1268_v59 }
 0x672   :  { %1414 = vpow2.f32 %v1269_v60 }
 0x67c   :  { %v1409_v56 = vpop.eup %1408 }
 0x67d   :  { %v1411_v58 = vpop.eup %1410  ;;  %470 = vrot.lane.b32.xlu0 %v1409_v56, %s1604_s18 }
 0x67e   :  { %472 = vrot.lane.b32.xlu1 %v1411_v58, %s1604_s18  ;;  %v1413_v61 = vpop.eup %1412 }
 0x67f   :  { %v1415_v62 = vpop.eup %1414  ;;  %v452_v63 = vadd.f32 1.0, %v1413_v61 }
 0x680   :  { %v453_v1 = vadd.f32 1.0, %v1415_v62 }
 0x681   :  { %1416 = vrcp.f32 %v452_v63 }
 0x682   :  { %1418 = vrcp.f32 %v453_v1 }
 0x68e   :  { %v1417_v2 = vpop.eup %1416 }
 0x68f   :  { %v1419_v4 = vpop.eup %1418  ;;  %v466_v11 = vmul.f32 %v1417_v2, %v462_v9 }
 0x690   :  { %v467_v12 = vmul.f32 %v1419_v4, %v463_v10 }
 0x6ef   :  { %v471_v3 = vpop.permute.xlu0 %470 }
 0x6f0   :  { %v473_v5 = vpop.permute.xlu1 %472  ;;  %v476_v6 = vmul.f32 %v1417_v2, %v471_v3 }
 0x6f1   :  { %v477_v7 = vmul.f32 %v1419_v4, %v473_v5 }
 0x6f2   :  { %480 = vrot.lane.b32.xlu0 %v476_v6, %s1603_s0 }
 0x6f3   :  { %482 = vrot.lane.b32.xlu1 %v477_v7, %s1603_s0 }
 0x764   :  { %v481_v13 = vpop.permute.xlu0 %480 }
 0x765   :  { %v483_v14 = vpop.permute.xlu1 %482  ;;  %v486_v15 = vadd.f32 %v481_v13, %v466_v11 }
 0x766   :  { %v487_v16 = vadd.f32 %v483_v14, %v467_v12 }
 0x767   :  { %1420 = vtanh.f32 %v486_v15  ;;  %v589_v60 = vrot.slane %v486_v15, 7 }
 0x768   :  { %1422 = vtanh.f32 %v487_v16  ;;  %v590_v61 = vrot.slane %v487_v16, 7 }
 0x774   :  { %v1421_v17 = vpop.eup %1420 }
 0x775   :  { %v1423_v18 = vpop.eup %1422  ;;  %492 = vrot.lane.b32.xlu0 %v1421_v17, %s1605_s2 }
 0x776   :  { %494 = vrot.lane.b32.xlu1 %v1423_v18, %s1605_s2 }
 0x7e7   :  { %v493_v19 = vpop.permute.xlu0 %492 }
 0x7e8   :  { %v495_v20 = vpop.permute.xlu1 %494  ;;  %v1766_v23 = vmul.f32 %v1417_v2, %v493_v19 }
 0x7e9   :  { %v1768_v24 = vmul.f32 %v1419_v4, %v495_v20 }
 0x7ea   :  { %v511_v25 = vpack.c.bf16 %v1766_v23, %v1766_v23 }
 0x7eb   :  { %v512_v26 = vpack.c.bf16 %v1768_v24, %v1768_v24 }
 0x7ec   :  { %v515_v27 = vunpack.c.l.b16 %v511_v25 }
 0x7ed   :  { %v516_v28 = vunpack.c.l.b16 %v512_v26 }
 0x7ee   :  { %v517_v29 = vrot.slane %v515_v27, 2 }
 0x7ef   :  { %v518_v30 = vrot.slane %v516_v28, 1 }
 0x7f1   :  { %v519_v31 = vsel %vm266_vm3, %v518_v30, %v517_v29 }
 0x7f2   :  { %v520_v32 = vpack.c.b16 %v519_v31, %v519_v31 }
 0x7f4   :  { %521 = vrot.lane.b32.xlu0 %v520_v32, %s1606_s19 }
 0x866   :  { %v522_v33 = vpop.permute.xlu0 %521 }
 0x867   :  { %1333 = vmatmul.mubr.msk.bf16.vlgmr.msra.gmra.mxu0 %vm94_vm2, %v522_v33 }
 0x868   :  { %1343 = vmatpush3.bf16.msra.mxu0 %v1676_v8  ;;  %1344 = vmatprep.mubr.msk.bf16.mxu0 %vm1602_vm1, %v1601_v0 }
 0x869   :  { %1354 = vmatprep.subr.bf16.mxu0 %v1601_v0 }
 0x927   :  { %v560_v34 = vpop.f32.mrf.mxu0 }
 0x928   :  { %v567_v35 = vrot.slane %v560_v34, 5  ;;  %v568_v37 = vrot.slane %v560_v34, 6 }
 0x929   :  { %v1334_v39 = vpop.f32.mrf.mxu0 }
 0x92a   :  { %v571_v40 = vadd.f32 %v567_v35, %v1696_v21  ;;  %v572_v41 = vadd.f32 %v568_v37, %v1698_v22 }
 0x92b   :  { %v563_v42 = vpop.f32.mrf.mxu0 }
 0x92c   :  { %1424 = vtanh.f32 %v571_v40  ;;  %v1271_v46 = vmul.f32 -1.442695, %v571_v40  ;;  %v1272_v47 = vmul.f32 -1.442695, %v572_v41 }
 0x92d   :  { %1426 = vtanh.f32 %v572_v41  ;;  %v1335_v43 = vpop.f32.mrf.mxu0 }
 0x92e   :  { %1428 = vpow2.f32 %v1271_v46 }
 0x92f   :  { %1430 = vpow2.f32 %v1272_v47 }
 0x939   :  { %v1425_v44 = vpop.eup %1424 }
 0x93a   :  { %v1427_v45 = vpop.eup %1426  ;;  %597 = vrot.lane.b32.xlu1 %v1425_v44, %s1604_s18 }
 0x93b   :  { %599 = vrot.lane.b32.xlu0 %v1427_v45, %s1604_s18  ;;  %v1429_v48 = vpop.eup %1428 }
 0x93c   :  { %v1431_v49 = vpop.eup %1430  ;;  %v579_v50 = vadd.f32 1.0, %v1429_v48 }
 0x93d   :  { %v580_v51 = vadd.f32 1.0, %v1431_v49 }
 0x93e   :  { %1432 = vrcp.f32 %v579_v50 }
 0x93f   :  { %1434 = vrcp.f32 %v580_v51 }
 0x94b   :  { %v1433_v52 = vpop.eup %1432 }
 0x94c   :  { %v1435_v55 = vpop.eup %1434  ;;  %v593_v62 = vmul.f32 %v1433_v52, %v589_v60 }
 0x94d   :  { %v594_v63 = vmul.f32 %v1435_v55, %v590_v61 }
 0x9ac   :  { %v598_v54 = vpop.permute.xlu1 %597 }
 0x9ad   :  { %v600_v56 = vpop.permute.xlu0 %599  ;;  %v603_v58 = vmul.f32 %v1433_v52, %v598_v54 }
 0x9ae   :  { %v604_v59 = vmul.f32 %v1435_v55, %v600_v56 }
 0x9af   :  { %607 = vrot.lane.b32.xlu1 %v603_v58, %s1603_s0 }
 0x9b0   :  { %609 = vrot.lane.b32.xlu0 %v604_v59, %s1603_s0 }
 0xa21   :  { %v608_v1 = vpop.permute.xlu1 %607 }
 0xa22   :  { %v610_v2 = vpop.permute.xlu0 %609  ;;  %v613_v3 = vadd.f32 %v608_v1, %v593_v62 }
 0xa23   :  { %v614_v4 = vadd.f32 %v610_v2, %v594_v63 }
 0xa24   :  { %1436 = vtanh.f32 %v613_v3  ;;  %v716_v49 = vrot.slane %v613_v3, 7 }
 0xa25   :  { %1438 = vtanh.f32 %v614_v4  ;;  %v717_v50 = vrot.slane %v614_v4, 7 }
 0xa31   :  { %v1437_v5 = vpop.eup %1436 }
 0xa32   :  { %v1439_v6 = vpop.eup %1438  ;;  %619 = vrot.lane.b32.xlu1 %v1437_v5, %s1605_s2 }
 0xa33   :  { %621 = vrot.lane.b32.xlu0 %v1439_v6, %s1605_s2 }
 0xaa4   :  { %v620_v7 = vpop.permute.xlu1 %619 }
 0xaa5   :  { %v622_v9 = vpop.permute.xlu0 %621  ;;  %v1789_v10 = vmul.f32 %v1433_v52, %v620_v7 }
 0xaa6   :  { %v1791_v11 = vmul.f32 %v1435_v55, %v622_v9 }
 0xaa7   :  { %v638_v12 = vpack.c.bf16 %v1789_v10, %v1789_v10 }
 0xaa8   :  { %v639_v13 = vpack.c.bf16 %v1791_v11, %v1791_v11 }
 0xaa9   :  { %v642_v14 = vunpack.c.l.b16 %v638_v12 }
 0xaaa   :  { %v643_v15 = vunpack.c.l.b16 %v639_v13 }
 0xaab   :  { %v644_v16 = vrot.slane %v642_v14, 3 }
 0xaac   :  { %v645_v17 = vrot.slane %v643_v15, 2 }
 0xaae   :  { %v646_v18 = vsel %vm266_vm3, %v645_v17, %v644_v16 }
 0xaaf   :  { %v647_v19 = vpack.c.b16 %v646_v18, %v646_v18 }
 0xab1   :  { %648 = vrot.lane.b32.xlu1 %v647_v19, %s1606_s19 }
 0xb23   :  { %v649_v20 = vpop.permute.xlu1 %648 }
 0xb24   :  { %1339 = vmatmul.mubr.msk.bf16.vlgmr.msra.gmra.mxu1 %vm94_vm2, %v649_v20 }
 0xb25   :  { %1349 = vmatpush3.bf16.msra.mxu1 %v1676_v8  ;;  %1350 = vmatprep.mubr.msk.bf16.mxu1 %vm1602_vm1, %v1601_v0 }
 0xbe4   :  { %v687_v25 = vpop.f32.mrf.mxu1 }
 0xbe5   :  { %v694_v26 = vrot.slane %v687_v25, 4  ;;  %v695_v27 = vrot.slane %v687_v25, 5 }
 0xbe6   :  { %v1340_v28 = vpop.f32.mrf.mxu1 }
 0xbe7   :  { %v698_v29 = vadd.f32 %v694_v26, %v1696_v21  ;;  %v699_v30 = vadd.f32 %v695_v27, %v1698_v22 }
 0xbe8   :  { %v690_v31 = vpop.f32.mrf.mxu1 }
 0xbe9   :  { %1440 = vtanh.f32 %v698_v29  ;;  %v1274_v35 = vmul.f32 -1.442695, %v698_v29  ;;  %v1275_v37 = vmul.f32 -1.442695, %v699_v30 }
 0xbea   :  { %1442 = vtanh.f32 %v699_v30  ;;  %v1341_v32 = vpop.f32.mrf.mxu1 }
 0xbeb   :  { %1444 = vpow2.f32 %v1274_v35 }
 0xbec   :  { %1446 = vpow2.f32 %v1275_v37 }
 0xbf6   :  { %v1441_v33 = vpop.eup %1440 }
 0xbf7   :  { %v1443_v34 = vpop.eup %1442  ;;  %724 = vrot.lane.b32.xlu0 %v1441_v33, %s1604_s18 }
 0xbf8   :  { %726 = vrot.lane.b32.xlu1 %v1443_v34, %s1604_s18  ;;  %v1445_v39 = vpop.eup %1444 }
 0xbf9   :  { %v1447_v40 = vpop.eup %1446  ;;  %v706_v41 = vadd.f32 1.0, %v1445_v39 }
 0xbfa   :  { %v707_v42 = vadd.f32 1.0, %v1447_v40 }
 0xbfb   :  { %1448 = vrcp.f32 %v706_v41 }
 0xbfc   :  { %1450 = vrcp.f32 %v707_v42 }
 0xc08   :  { %v1449_v43 = vpop.eup %1448 }
 0xc09   :  { %v1451_v45 = vpop.eup %1450  ;;  %v720_v51 = vmul.f32 %v1449_v43, %v716_v49 }
 0xc0a   :  { %v721_v52 = vmul.f32 %v1451_v45, %v717_v50 }
 0xc69   :  { %v725_v44 = vpop.permute.xlu0 %724 }
 0xc6a   :  { %v727_v46 = vpop.permute.xlu1 %726  ;;  %v730_v47 = vmul.f32 %v1449_v43, %v725_v44 }
 0xc6b   :  { %v731_v48 = vmul.f32 %v1451_v45, %v727_v46 }
 0xc6c   :  { %734 = vrot.lane.b32.xlu0 %v730_v47, %s1603_s0 }
 0xc6d   :  { %736 = vrot.lane.b32.xlu1 %v731_v48, %s1603_s0 }
 0xcde   :  { %v735_v54 = vpop.permute.xlu0 %734 }
 0xcdf   :  { %v737_v55 = vpop.permute.xlu1 %736  ;;  %v740_v56 = vadd.f32 %v735_v54, %v720_v51 }
 0xce0   :  { %v741_v58 = vadd.f32 %v737_v55, %v721_v52 }
 0xce1   :  { %1452 = vtanh.f32 %v740_v56  ;;  %v843_v41 = vrot.slane %v740_v56, 7 }
 0xce2   :  { %1454 = vtanh.f32 %v741_v58  ;;  %v844_v42 = vrot.slane %v741_v58, 7 }
 0xcee   :  { %v1453_v59 = vpop.eup %1452 }
 0xcef   :  { %v1455_v60 = vpop.eup %1454  ;;  %746 = vrot.lane.b32.xlu0 %v1453_v59, %s1605_s2 }
 0xcf0   :  { %748 = vrot.lane.b32.xlu1 %v1455_v60, %s1605_s2 }
 0xd61   :  { %v747_v61 = vpop.permute.xlu0 %746 }
 0xd62   :  { %v749_v62 = vpop.permute.xlu1 %748  ;;  %v1811_v63 = vmul.f32 %v1449_v43, %v747_v61 }
 0xd63   :  { %v1813_v1 = vmul.f32 %v1451_v45, %v749_v62 }
 0xd64   :  { %v765_v2 = vpack.c.bf16 %v1811_v63, %v1811_v63 }
 0xd65   :  { %v766_v3 = vpack.c.bf16 %v1813_v1, %v1813_v1 }
 0xd66   :  { %v769_v4 = vunpack.c.l.b16 %v765_v2 }
 0xd67   :  { %v770_v5 = vunpack.c.l.b16 %v766_v3 }
 0xd68   :  { %v771_v6 = vrot.slane %v769_v4, 4 }
 0xd69   :  { %v772_v7 = vrot.slane %v770_v5, 3 }
 0xd6b   :  { %v773_v9 = vsel %vm266_vm3, %v772_v7, %v771_v6 }
 0xd6c   :  { %v774_v12 = vpack.c.b16 %v773_v9, %v773_v9 }
 0xd6e   :  { %775 = vrot.lane.b32.xlu0 %v774_v12, %s1606_s19 }
 0xde0   :  { %v776_v13 = vpop.permute.xlu0 %775 }
 0xde1   :  { %1345 = vmatmul.mubr.msk.bf16.vlgmr.msra.gmra.mxu0 %vm94_vm2, %v776_v13 }
 0xde2   :  { %1355 = vmatpush3.bf16.msra.mxu0 %v1676_v8  ;;  %1356 = vmatprep.mubr.msk.bf16.mxu0 %vm1602_vm1, %v1601_v0 }
 0xea1   :  { %v814_v14 = vpop.f32.mrf.mxu0 }
 0xea2   :  { %v821_v15 = vrot.slane %v814_v14, 3  ;;  %v822_v16 = vrot.slane %v814_v14, 4 }
 0xea3   :  { %v1346_v17 = vpop.f32.mrf.mxu0 }
 0xea4   :  { %v825_v18 = vadd.f32 %v821_v15, %v1696_v21  ;;  %v826_v19 = vadd.f32 %v822_v16, %v1698_v22 }
 0xea5   :  { %v817_v20 = vpop.f32.mrf.mxu0 }
 0xea6   :  { %1456 = vtanh.f32 %v825_v18  ;;  %v1277_v8 = vmul.f32 -1.442695, %v825_v18  ;;  %v1278_v28 = vmul.f32 -1.442695, %v826_v19 }
 0xea7   :  { %1458 = vtanh.f32 %v826_v19  ;;  %v1347_v25 = vpop.f32.mrf.mxu0 }
 0xea8   :  { %1460 = vpow2.f32 %v1277_v8 }
 0xea9   :  { %1462 = vpow2.f32 %v1278_v28 }
 0xeb3   :  { %v1457_v26 = vpop.eup %1456 }
 0xeb4   :  { %v1459_v27 = vpop.eup %1458  ;;  %851 = vrot.lane.b32.xlu1 %v1457_v26, %s1604_s18 }
 0xeb5   :  { %853 = vrot.lane.b32.xlu0 %v1459_v27, %s1604_s18  ;;  %v1461_v29 = vpop.eup %1460 }
 0xeb6   :  { %v1463_v30 = vpop.eup %1462  ;;  %v833_v31 = vadd.f32 1.0, %v1461_v29 }
 0xeb7   :  { %v834_v32 = vadd.f32 1.0, %v1463_v30 }
 0xeb8   :  { %1464 = vrcp.f32 %v833_v31 }
 0xeb9   :  { %1466 = vrcp.f32 %v834_v32 }
 0xec5   :  { %v1465_v33 = vpop.eup %1464 }
 0xec6   :  { %v1467_v35 = vpop.eup %1466  ;;  %v847_v43 = vmul.f32 %v1465_v33, %v843_v41 }
 0xec7   :  { %v848_v44 = vmul.f32 %v1467_v35, %v844_v42 }
 0xf26   :  { %v852_v34 = vpop.permute.xlu1 %851 }
 0xf27   :  { %v854_v37 = vpop.permute.xlu0 %853  ;;  %v857_v39 = vmul.f32 %v1465_v33, %v852_v34 }
 0xf28   :  { %v858_v40 = vmul.f32 %v1467_v35, %v854_v37 }
 0xf29   :  { %861 = vrot.lane.b32.xlu1 %v857_v39, %s1603_s0 }
 0xf2a   :  { %863 = vrot.lane.b32.xlu0 %v858_v40, %s1603_s0 }
 0xf9b   :  { %v862_v45 = vpop.permute.xlu1 %861 }
 0xf9c   :  { %v864_v46 = vpop.permute.xlu0 %863  ;;  %v867_v47 = vadd.f32 %v862_v45, %v847_v43 }
 0xf9d   :  { %v868_v48 = vadd.f32 %v864_v46, %v848_v44 }
 0xf9e   :  { %1468 = vtanh.f32 %v867_v47 }
 0xf9f   :  { %1470 = vtanh.f32 %v868_v48  ;;  %v971_v34 = vrot.slane %v868_v48, 7 }
 0xfab   :  { %v1469_v49 = vpop.eup %1468 }
 0xfac   :  { %v1471_v50 = vpop.eup %1470  ;;  %873 = vrot.lane.b32.xlu1 %v1469_v49, %s1605_s2 }
 0xfad   :  { %875 = vrot.lane.b32.xlu0 %v1471_v50, %s1605_s2 }
0x101e   :  { %v874_v51 = vpop.permute.xlu1 %873 }
0x101f   :  { %v876_v52 = vpop.permute.xlu0 %875  ;;  %v1833_v54 = vmul.f32 %v1465_v33, %v874_v51  ;;  %v970_v33 = vrot.slane %v867_v47, 7 }
0x1020   :  { %v1835_v55 = vmul.f32 %v1467_v35, %v876_v52 }
0x1021   :  { %v892_v56 = vpack.c.bf16 %v1833_v54, %v1833_v54 }
0x1022   :  { %v893_v58 = vpack.c.bf16 %v1835_v55, %v1835_v55 }
0x1023   :  { %v896_v59 = vunpack.c.l.b16 %v892_v56 }
0x1024   :  { %v897_v60 = vunpack.c.l.b16 %v893_v58 }
0x1025   :  { %v898_v61 = vrot.slane %v896_v59, 5 }
0x1026   :  { %v899_v62 = vrot.slane %v897_v60, 4 }
0x1028   :  { %v900_v2 = vsel %vm266_vm3, %v899_v62, %v898_v61 }
0x1029   :  { %v901_v3 = vpack.c.b16 %v900_v2, %v900_v2 }
0x102b   :  { %902 = vrot.lane.b32.xlu1 %v901_v3, %s1606_s19 }
0x109d   :  { %v903_v4 = vpop.permute.xlu1 %902 }
0x109e   :  { %1351 = vmatmul.mubr.msk.bf16.vlgmr.msra.gmra.mxu1 %vm94_vm2, %v903_v4 }
0x115e   :  { %v941_v5 = vpop.f32.mrf.mxu1 }
0x115f   :  { %v948_v6 = vrot.slane %v941_v5, 2  ;;  %v949_v7 = vrot.slane %v941_v5, 3 }
0x1160   :  { %v1352_v9 = vpop.f32.mrf.mxu1 }
0x1161   :  { %v952_v12 = vadd.f32 %v948_v6, %v1696_v21  ;;  %v953_v13 = vadd.f32 %v949_v7, %v1698_v22 }
0x1162   :  { %v944_v14 = vpop.f32.mrf.mxu1 }
0x1163   :  { %1472 = vtanh.f32 %v952_v12  ;;  %v1280_v18 = vmul.f32 -1.442695, %v952_v12  ;;  %v1281_v19 = vmul.f32 -1.442695, %v953_v13 }
0x1164   :  { %1474 = vtanh.f32 %v953_v13  ;;  %v1353_v15 = vpop.f32.mrf.mxu1 }
0x1165   :  { %1476 = vpow2.f32 %v1280_v18 }
0x1166   :  { %1478 = vpow2.f32 %v1281_v19 }
0x1170   :  { %v1473_v16 = vpop.eup %1472 }
0x1171   :  { %v1475_v17 = vpop.eup %1474  ;;  %978 = vrot.lane.b32.xlu0 %v1473_v16, %s1604_s18 }
0x1172   :  { %980 = vrot.lane.b32.xlu1 %v1475_v17, %s1604_s18  ;;  %v1477_v20 = vpop.eup %1476 }
0x1173   :  { %v1479_v25 = vpop.eup %1478  ;;  %v960_v26 = vadd.f32 1.0, %v1477_v20 }
0x1174   :  { %v961_v27 = vadd.f32 1.0, %v1479_v25 }
0x1175   :  { %1480 = vrcp.f32 %v960_v26 }
0x1176   :  { %1482 = vrcp.f32 %v961_v27 }
0x1182   :  { %v1481_v8 = vpop.eup %1480 }
0x1183   :  { %v1483_v29 = vpop.eup %1482  ;;  %v974_v35 = vmul.f32 %v1481_v8, %v970_v33 }
0x1184   :  { %v975_v37 = vmul.f32 %v1483_v29, %v971_v34 }
0x11e3   :  { %v979_v28 = vpop.permute.xlu0 %978 }
0x11e4   :  { %v981_v30 = vpop.permute.xlu1 %980  ;;  %v984_v31 = vmul.f32 %v1481_v8, %v979_v28 }
0x11e5   :  { %v985_v32 = vmul.f32 %v1483_v29, %v981_v30 }
0x11e6   :  { %988 = vrot.lane.b32.xlu0 %v984_v31, %s1603_s0 }
0x11e7   :  { %990 = vrot.lane.b32.xlu1 %v985_v32, %s1603_s0 }
0x1258   :  { %v989_v39 = vpop.permute.xlu0 %988 }
0x1259   :  { %v991_v40 = vpop.permute.xlu1 %990  ;;  %v994_v41 = vadd.f32 %v989_v39, %v974_v35 }
0x125a   :  { %v995_v42 = vadd.f32 %v991_v40, %v975_v37  ;;  %v76_v40 = vld [vmem:[%s1956_s4] sm:$0x3]  ;;  %s1608_s4 = smov 112  }
0x125b   :  { %1484 = vtanh.f32 %v994_v41  ;;  %v1097_v28 = vrot.slane %v994_v41, 7 }
0x125c   :  { %1486 = vtanh.f32 %v995_v42 }
0x1268   :  { %v1485_v43 = vpop.eup %1484 }
0x1269   :  { %v1487_v44 = vpop.eup %1486  ;;  %1000 = vrot.lane.b32.xlu0 %v1485_v43, %s1605_s2 }
0x126a   :  { %1002 = vrot.lane.b32.xlu1 %v1487_v44, %s1605_s2 }
0x12db   :  { %v1001_v45 = vpop.permute.xlu0 %1000 }
0x12dc   :  { %v1003_v46 = vpop.permute.xlu1 %1002  ;;  %v1852_v49 = vmul.f32 %v1481_v8, %v1001_v45  ;;  %v1607_v8 = vmov 0  }
0x12dd   :  { %v1854_v47 = vmul.f32 %v1483_v29, %v1003_v46  ;;  %1374 = vset.pattern.permute.xlu1 %v1607_v8  ;;  %1375 = vset.pattern.permute.xlu0 %v1607_v8  ;;  %v1098_v29 = vrot.slane %v995_v42, 7 }
0x12de   :  { %v1019_v48 = vpack.c.bf16 %v1852_v49, %v1852_v49 }
0x12df   :  { %v1020_v50 = vpack.c.bf16 %v1854_v47, %v1854_v47 }
0x12e0   :  { %v1023_v51 = vunpack.c.l.b16 %v1019_v48 }
0x12e1   :  { %v1024_v52 = vunpack.c.l.b16 %v1020_v50 }
0x12e2   :  { %v1025_v56 = vrot.slane %v1023_v51, 6 }
0x12e3   :  { %v1026_v58 = vrot.slane %v1024_v52, 5 }
0x12e5   :  { %v1027_v59 = vsel %vm266_vm3, %v1026_v58, %v1025_v56 }
0x12e6   :  { %v1028_v60 = vpack.c.b16 %v1027_v59, %v1027_v59 }
0x12e8   :  { %1029 = vrot.lane.b32.xlu0 %v1028_v60, %s1606_s19 }
0x135a   :  { %v1030_v61 = vpop.permute.xlu0 %1029 }
0x135b   :  { %1357 = vmatmul.mubr.msk.bf16.vlgmr.msra.gmra.mxu0 %vm94_vm2, %v1030_v61 }
0x141b   :  { %v1068_v62 = vpop.f32.mrf.mxu0 }
0x141c   :  { %v1075_v2 = vrot.slane %v1068_v62, 1  ;;  %v1076_v3 = vrot.slane %v1068_v62, 2 }
0x141d   :  { %v1358_v4 = vpop.f32.mrf.mxu0 }
0x141e   :  { %v1079_v5 = vadd.f32 %v1075_v2, %v1696_v21  ;;  %v1080_v6 = vadd.f32 %v1076_v3, %v1698_v22 }
0x141f   :  { %v1071_v7 = vpop.f32.mrf.mxu0 }
0x1420   :  { %1488 = vtanh.f32 %v1079_v5  ;;  %v1283_v14 = vmul.f32 -1.442695, %v1079_v5  ;;  %v1284_v15 = vmul.f32 -1.442695, %v1080_v6 }
0x1421   :  { %1490 = vtanh.f32 %v1080_v6  ;;  %v1359_v9 = vpop.f32.mrf.mxu0  ;;  %v1508_v6 = vld [vmem:[#allocation4] sm:$0xff] }
0x1422   :  { %1492 = vpow2.f32 %v1283_v14  ;;  %v1509_v9 = vld [vmem:[#allocation4 + $0x8] sm:$0xff] }
0x1423   :  { %1494 = vpow2.f32 %v1284_v15 }
0x142d   :  { %v1489_v12 = vpop.eup %1488 }
0x142e   :  { %v1491_v13 = vpop.eup %1490  ;;  %1105 = vrot.lane.b32.xlu1 %v1489_v12, %s1604_s18 }
0x142f   :  { %1107 = vrot.lane.b32.xlu0 %v1491_v13, %s1604_s18  ;;  %v1493_v16 = vpop.eup %1492 }
0x1430   :  { %v1495_v17 = vpop.eup %1494  ;;  %v1087_v18 = vadd.f32 1.0, %v1493_v16 }
0x1431   :  { %v1088_v21 = vadd.f32 1.0, %v1495_v17 }
0x1432   :  { %1496 = vrcp.f32 %v1087_v18 }
0x1433   :  { %1498 = vrcp.f32 %v1088_v21 }
0x143f   :  { %v1497_v22 = vpop.eup %1496 }
0x1440   :  { %v1499_v20 = vpop.eup %1498  ;;  %v1101_v30 = vmul.f32 %v1497_v22, %v1097_v28 }
0x1441   :  { %v1102_v31 = vmul.f32 %v1499_v20, %v1098_v29 }
0x14a0   :  { %v1106_v19 = vpop.permute.xlu1 %1105 }
0x14a1   :  { %v1108_v25 = vpop.permute.xlu0 %1107  ;;  %v1111_v26 = vmul.f32 %v1497_v22, %v1106_v19 }
0x14a2   :  { %v1112_v27 = vmul.f32 %v1499_v20, %v1108_v25 }
0x14a3   :  { %1115 = vrot.lane.b32.xlu1 %v1111_v26, %s1603_s0 }
0x14a4   :  { %1117 = vrot.lane.b32.xlu0 %v1112_v27, %s1603_s0 }
0x1515   :  { %v1116_v32 = vpop.permute.xlu1 %1115 }
0x1516   :  { %v1118_v33 = vpop.permute.xlu0 %1117  ;;  %v1869_v34 = vadd.f32 %v1116_v32, %v1101_v30 }
0x1517   :  { %v1871_v35 = vadd.f32 %v1118_v33, %v1102_v31 }
0x1518   :  { %1500 = vtanh.f32 %v1869_v34 }
0x1519   :  { %1502 = vtanh.f32 %v1871_v35  ;;  %v1154_v16 = vrot.slane %v1871_v35, 7 }
0x1525   :  { %v1501_v37 = vpop.eup %1500 }
0x1526   :  { %v1503_v39 = vpop.eup %1502  ;;  %1127 = vrot.lane.b32.xlu1 %v1501_v37, %s1605_s2 }
0x1527   :  { %1129 = vrot.lane.b32.xlu0 %v1503_v39, %s1605_s2 }
0x152a   :  { %1169 = vperm.xlu1 %1374, %v76_v40  }
0x152b   :  { %250 = vrot.lane.b32.xlu0 %v1718_v57, %s1606_s19 }
0x152e   :  { %252 = vrot.lane.b32.xlu1 %v1714_v53, %s1606_s19 }
0x152f   :  { %376 = vrot.lane.b32.xlu0 %v1744_v38, %s1606_s19 }
0x1532   :  { %378 = vrot.lane.b32.xlu1 %v1742_v36, %s1606_s19 }
0x1533   :  { %502 = vrot.lane.b32.xlu0 %v1766_v23, %s1606_s19  ;;  %v1164_v23 = vlaneseq }
0x1536   :  { %504 = vrot.lane.b32.xlu1 %v1768_v24, %s1606_s19 }
0x1537   :  { %629 = vrot.lane.b32.xlu0 %v1789_v10, %s1606_s19  ;;  %v1175_v10 = vshrl.u32 %v1164_v23, 7 }
0x153a   :  { %631 = vrot.lane.b32.xlu1 %v1791_v11, %s1606_s19 }
0x153b   :  { %756 = vrot.lane.b32.xlu0 %v1811_v63, %s1606_s19  ;;  %v1165_v63 = vand.u32 127, %v1164_v23 }
0x153e   :  { %758 = vrot.lane.b32.xlu1 %v1813_v1, %s1606_s19  ;;  %v1183_v1 = vsub.s32 1, %v1175_v10 }
0x153f   :  { %883 = vrot.lane.b32.xlu0 %v1833_v54, %s1606_s19  ;;  %v1176_v54 = vsub.s32 0, %v1175_v10 }
0x1542   :  { %885 = vrot.lane.b32.xlu1 %v1835_v55, %s1606_s19 }
0x1543   :  { %1010 = vrot.lane.b32.xlu0 %v1852_v49, %s1606_s19 }
0x1546   :  { %1012 = vrot.lane.b32.xlu1 %v1854_v47, %s1606_s19 }
0x1598   :  { %v1128_v53 = vpop.permute.xlu1 %1127 }
0x1599   :  { %v1130_v57 = vpop.permute.xlu0 %1129  ;;  %v1133_v36 = vmul.f32 %v1497_v22, %v1128_v53  ;;  %v1286_v53 = vld [vmem:[%s1957_s5] ss:$0 sm:$0xff]  ;;  %s1570_s5 = scalar_lea.vmem %s1247_s27, 256 }
0x159a   :  { %v1908_v38 = vmul.f32 %v1499_v20, %v1130_v57  ;;  %p1571_p1 = scmp.ne.s32.totalorder %s1247_s27, %s1570_s5  ;;  %p1576_p3 = scmp.lt.s32.totalorder %s1570_s5, %s1570_s5 }
0x159b   :  { %1137 = vrot.lane.b32.xlu0 %v1133_v36, %s1606_s19 }
0x159c   :  { %1139 = vrot.lane.b32.xlu1 %v1908_v38, %s1606_s19  ;;  %v1146_v15 = vrot.slane %v1908_v38, 7  ;;  %p1577_p4 = por %p1576_p3, %p1575_p2 }
0x159d   :  { %v251_v24 = vpop.permute.xlu0 %250 }
0x159e   :  { %257 = vst.msk [vmem:[#allocation10] sm:$0x1] %vm256_vm4, %v251_v24  ;;  %p1578_p5 = pnand %p1577_p4, %p1571_p1 }
0x15a1   :  { %v377_v11 = vpop.permute.xlu0 %376 }
0x15a2   :  { %383 = vst.msk [vmem:[#allocation10] sm:$0x2] %vm382_vm5, %v377_v11 }
0x15a5   :  { %v503_v55 = vpop.permute.xlu0 %502  ;;  %v1170_v41 = vpop.permute.xlu1 %1169 }
0x15a6   :  { %509 = vst.msk [vmem:[#allocation10] sm:$0x4] %vm508_vm6, %v503_v55  ;;  %vm1171_vm7 = vcmp.lt.s32.totalorder %v1165_v63, %v1170_v41 }
0x15a7   :  { %v1285_v42 = vsel %vm1171_vm7, 1.0, %v1601_v0 }
0x15a8   :  { %v1184_v43 = vrot.slane %v1285_v42, %v1183_v1  ;;  %v1177_v44 = vrot.slane %v1285_v42, %v1176_v54 }
0x15a9   :  { %v630_v45 = vpop.permute.xlu0 %629  ;;  %v253_v46 = vpop.permute.xlu1 %252 }
0x15aa   :  { %636 = vst.msk [vmem:[#allocation10] sm:$0x8] %vm635_vm8, %v630_v45  ;;  %1186 = vbcast.lane.b32.xlu1 %v1184_v43, 256  ;;  %1179 = vbcast.lane.b32.xlu0 %v1177_v44, 256 }
0x15ab   :  { %258 = vst.msk [vmem:[#allocation10 + $0x8] sm:$0x1] %vm256_vm4, %v253_v46 }
0x15ad   :  { %v757_v49 = vpop.permute.xlu0 %756  ;;  %v379_v47 = vpop.permute.xlu1 %378 }
0x15ae   :  { %763 = vst.msk [vmem:[#allocation10] sm:$0x10] %vm762_vm9, %v757_v49 }
0x15af   :  { %384 = vst.msk [vmem:[#allocation10 + $0x8] sm:$0x2] %vm382_vm5, %v379_v47 }
0x15b1   :  { %v884_v0 = vpop.permute.xlu0 %883  ;;  %v505_v48 = vpop.permute.xlu1 %504 }
0x15b2   :  { %890 = vst.msk [vmem:[#allocation10] sm:$0x20] %vm889_vm10, %v884_v0 }
0x15b3   :  { %510 = vst.msk [vmem:[#allocation10 + $0x8] sm:$0x4] %vm508_vm6, %v505_v48 }
0x15b5   :  { %v1011_v50 = vpop.permute.xlu0 %1010  ;;  %v632_v51 = vpop.permute.xlu1 %631 }
0x15b6   :  { %1017 = vst.msk [vmem:[#allocation10] sm:$0x40] %vm1016_vm11, %v1011_v50 }
0x15b7   :  { %637 = vst.msk [vmem:[#allocation10 + $0x8] sm:$0x8] %vm635_vm8, %v632_v51 }
0x15b9   :  { %v759_v52 = vpop.permute.xlu1 %758 }
0x15ba   :  { %764 = vst.msk [vmem:[#allocation10 + $0x8] sm:$0x10] %vm762_vm9, %v759_v52 }
0x15bd   :  { %v886_v56 = vpop.permute.xlu1 %885 }
0x15be   :  { %891 = vst.msk [vmem:[#allocation10 + $0x8] sm:$0x20] %vm889_vm10, %v886_v56 }
0x15c1   :  { %v1013_v58 = vpop.permute.xlu1 %1012 }
0x15c2   :  { %1018 = vst.msk [vmem:[#allocation10 + $0x8] sm:$0x40] %vm1016_vm11, %v1013_v58 }
0x160d   :  { %v1138_v59 = vpop.permute.xlu0 %1137 }
0x160e   :  { %1144 = vst.msk [vmem:[#allocation10] sm:$0x80] %vm1143_vm12, %v1138_v59  ;;  %1150 = vst.msk [vmem:[#allocation2 - $0x7] sm:$0x80] %vm1143_vm12, %v1138_v59  ;;  %v1140_v60 = vpop.permute.xlu1 %1139 }
0x160f   :  { %1145 = vst.msk [vmem:[#allocation10 + $0x8] sm:$0x80] %vm1143_vm12, %v1140_v60 }
0x1615   :  { %v1188_v61 = vld [vmem:[#allocation10] sm:$0xff] }
0x1616   :  { %v1189_v2 = vld [vmem:[#allocation10 + $0x8] sm:$0xff] }
0x161c   :  { %v1180_v62 = vpop.permute.xlu0 %1179  ;;  %v1187_v3 = vpop.permute.xlu1 %1186 }
0x161d   :  { %v1190_v4 = vmul.f32 %v1188_v61, %v1180_v62  ;;  %v1191_v5 = vmul.f32 %v1189_v2, %v1187_v3 }
0x161f   :  { %v1192_v7 = vadd.f32 %v1508_v6, %v1190_v4  ;;  %v1193_v12 = vadd.f32 %v1509_v9, %v1191_v5 }
0x1621   :  { %v1194_v13 = vsel %vm94_vm2, %v1192_v7, 0.0  ;;  %v1197_v14 = vsel %vm94_vm2, %v1193_v12, 0.0 }
0x1622   :  { %1195 = vadd.xlane.f32.xlu0 %v1194_v13  ;;  %1198 = vadd.xlane.f32.xlu1 %v1197_v14 }
0x1633   :  { %1147 = vrot.lane.b32.xlu1 %v1146_v15, %s1606_s19 }
0x1637   :  { %1157 = vrot.lane.b32.xlu1 %v1154_v16, %s1608_s4 }
0x16ab   :  { %v1196_v17 = vpop.xlane.xlu0 %1195  ;;  %v1199_v18 = vpop.xlane.xlu1 %1198 }
0x16ac   :  { %v1201_v21 = vmul.f32 0.0625, %v1196_v17  ;;  %v1202_v22 = vmul.f32 0.0625, %v1199_v18 }
0x16ae   :  { %v1203_v19 = vsub.f32 %v1192_v7, %v1201_v21  ;;  %v1204_v20 = vsub.f32 %v1193_v12, %v1202_v22 }
0x16af   :  { %v1148_v25 = vpop.permute.xlu1 %1147 }
0x16b0   :  { %1151 = vst.msk [vmem:[#allocation2 + $0x1] sm:$0x1] %vm256_vm4, %v1148_v25  ;;  %v1205_v26 = vmul.f32 %v1203_v19, %v1203_v19  ;;  %v1206_v8 = vmul.f32 %v1204_v20, %v1204_v20 }
0x16b2   :  { %v1207_v27 = vsel %vm94_vm2, %v1205_v26, 0.0  ;;  %v1210_v29 = vsel %vm94_vm2, %v1206_v8, 0.0 }
0x16b3   :  { %1208 = vadd.xlane.f32.xlu0 %v1207_v27  ;;  %v1158_v28 = vpop.permute.xlu1 %1157 }
0x16b4   :  { %1162 = vst.msk [vmem:[#allocation3 + $0x1] sm:$0x1] %vm256_vm4, %v1158_v28 }
0x16b7   :  { %1211 = vadd.xlane.f32.xlu0 %v1210_v29 }
0x16cd   :  { %1155 = vrot.lane.b32.xlu0 %v1869_v34, %s1608_s4  ;;  %v1287_v34 = vld [vmem:[%s1958_s6] ss:$0 sm:$0xff] }
0x173c   :  { %v1209_v30 = vpop.xlane.xlu0 %1208 }
0x173d   :  { %v1213_v31 = vmul.f32 0.0625, %v1209_v30 }
0x173f   :  { %v1215_v32 = vadd.f32 1e-05, %v1213_v31 }
0x1740   :  { %v1212_v33 = vpop.xlane.xlu0 %1211 }
0x1741   :  { %1504 = vrsqrt.f32 %v1215_v32  ;;  %v1214_v35 = vmul.f32 0.0625, %v1212_v33 }
0x1743   :  { %v1216_v37 = vadd.f32 1e-05, %v1214_v35 }
0x1744   :  { %v1156_v39 = vpop.permute.xlu0 %1155 }
0x1745   :  { %1506 = vrsqrt.f32 %v1216_v37  ;;  %1161 = vst.msk [vmem:[#allocation3 - $0x7] sm:$0x80] %vm1143_vm12, %v1156_v39 }
0x174e   :  { %v1505_v40 = vpop.eup %1504 }
0x174f   :  { %v1219_v57 = vmul.f32 %v1505_v40, %v1203_v19 }
0x1751   :  { %v1227_v36 = vmul.f32 %v1286_v53, %v1219_v57 }
0x1752   :  { %v1507_v38 = vpop.eup %1506 }
0x1753   :  { %v1235_v23 = vadd.f32 %v1287_v34, %v1227_v36  ;;  %v1220_v24 = vmul.f32 %v1507_v38, %v1204_v20 }
0x1755   :  { %v1237_v10 = vmul.f32 %v1235_v23, %v1180_v62  ;;  %v1228_v11 = vmul.f32 %v1286_v53, %v1220_v24 }
0x1757   :  { %1239 = vst.msk [vmem:[#allocation10] sm:$0xff] %vm94_vm2, %v1237_v10  ;;  %v1236_v63 = vadd.f32 %v1287_v34, %v1228_v11 }
0x1759   :  { %v1238_v1 = vmul.f32 %v1236_v63, %v1187_v3 }
0x175b   :  { %1240 = vst.msk [vmem:[#allocation10 + $0x8] sm:$0xff] %vm94_vm2, %v1238_v1 }
0x175c   :  { %1581 = shalt.err (!%p1578_p5)
}
0x175d   :  { %1252 = dma.vmem_to_hbm [thread:$0]  %s1247_s27, 256, %s1959_s7, [#allocation6], %s1598_s29, %s1598_s29, %s1599_s30  }
0x175e   :  { %1594 = dma.done.wait [#allocation6], 256  }
0x175f   :  { %1595 = vsyncadd [#allocation6], 4294967040 }
0x1760   :  { %1256 = vsyncpa [#allocation5], 1 }
0x1761   :  { %1257 = vsyncpa [#allocation8], 1 }
0x1762   :  { %1258 = vsyncpa [#allocation6], 1 }

</bundles_post_ra>
